<compile_context>
chip_gen: v6e
topology: v6e:2x2x1
jax: 0.10.0
libtpu: 0.0.40
codegen_flags: <defaults>
</compile_context>

<pallas_src>
import functools
import math

import jax
import jax.numpy as jnp
from jax.experimental import pallas as pl
from jax.experimental.pallas import tpu as pltpu


# ----------------------------- fused decoder kernel ----------------------------- #

def _fused_decoder_kernel(x_ref, *refs, meta, eps):
    """All four DecoderModules fused into one kernel invocation.

    x_ref : (M, 256)   pixel rows (n, i, j) of the decoder input, channels last.
    refs  : w_1..w_L   (G_in*Cin_p, G_out*Cout_p) block-diagonal matmul weights,
            gb         (2L, >=128) packed gamma (rows 2l) / beta (rows 2l+1),
            out        (M, G_L*Cout_p_L) final un-shuffled activation slab.
    meta  : static ((G_out, Cout_p), ...) per-layer layout info.
    """
    L = len(meta)
    w_refs = refs[:L]
    gb_ref = refs[L]
    o_ref = refs[L + 1]

    y = x_ref[...]
    m = y.shape[0]

    for l, (G, C) in enumerate(meta):
        w = w_refs[l][...]
        # ConvTranspose2d(k=s, stride=s) == per-pixel matmul on the MXU.  The
        # block-diagonal weight absorbs the (M, G*C) -> (M*G, C) pixel shuffle so
        # activations are never re-laid-out inside VMEM.  Conv bias intentionally
        # absent: cancelled by training-mode BN.
        y = jnp.dot(y.astype(w.dtype), w, preferred_element_type=jnp.float32)  # (M, G*C) f32

        inv_cnt = 1.0 / (m * G)                                     # static

        # ---- BatchNorm2d, training mode (batch stats), f32, two-pass ----
        col_sum = jnp.sum(y, axis=0, keepdims=True)                 # (1, G*C)
        ch_sum = col_sum[:, :C]
        for g in range(1, G):                                       # pool sub-pixel groups
            ch_sum = ch_sum + col_sum[:, g * C:(g + 1) * C]
        mean = ch_sum * inv_cnt                                     # (1, C)
        mean_w = mean if G == 1 else jnp.concatenate([mean] * G, axis=1)

        d = y - mean_w                                              # centered
        col_ss = jnp.sum(d * d, axis=0, keepdims=True)              # (1, G*C)
        ch_ss = col_ss[:, :C]
        for g in range(1, G):
            ch_ss = ch_ss + col_ss[:, g * C:(g + 1) * C]
        inv_std = jax.lax.rsqrt(ch_ss * inv_cnt + eps)              # (1, C), EUP

        gamma = gb_ref[2 * l:2 * l + 1, :C]
        beta = gb_ref[2 * l + 1:2 * l + 2, :C]
        scale = gamma * inv_std                                     # (1, C)
        scale_w = scale if G == 1 else jnp.concatenate([scale] * G, axis=1)
        beta_w = beta if G == 1 else jnp.concatenate([beta] * G, axis=1)

        y = jnp.maximum(d * scale_w + beta_w, 0.0)                  # BN affine + ReLU

    o_ref[...] = y.astype(o_ref.dtype)                              # lane-dense store (128-mult)


def fused_decoder_call(rows, w_mats, gb_slab, meta, *, eps=1e-5):
    M = rows.shape[0]
    out_width = meta[-1][0] * meta[-1][1]
    kernel = functools.partial(_fused_decoder_kernel, meta=meta, eps=eps)
    return pl.pallas_call(
        kernel,
        out_shape=jax.ShapeDtypeStruct((M, out_width), jnp.float32),
        # No grid and default (whole-array) BlockSpecs: each operand is one full
        # VMEM-resident block, invoked once -> no pipelining, no double-buffering.
        compiler_params=pltpu.CompilerParams(vmem_limit_bytes=32 * 1024 * 1024),
    )(rows, *w_mats, gb_slab)


# ----------------------- one-time parameter preprocessing ----------------------- #

def prepare_decoder(params, *, compute_dtype=jnp.float32, lane=128):
    """Host-side, outside-jit preprocessing of PyTorch-layout parameters into the
    fused kernel's operands.  Returns (w_mats, gb_slab, meta, strides, c_out)."""
    w_mats, meta, strides = [], [], []
    g_list, b_list = [], []
    G_in = 1
    cin_p = int(params[0][0].shape[0])            # 256, never padded
    for (w, _bias, gamma, beta, s) in params:     # conv bias dropped (BN no-op)
        cin, cout = int(w.shape[0]), int(w.shape[1])
        ss = s * s
        G_out = G_in * ss
        # Lane-pad Cout so this layer's (M, G_out*Cout_p) width is a multiple of
        # the 128-lane vreg width -> lane-dense matmuls/stores (load-bearing on v5e).
        if (G_out * cout) % lane == 0:
            cout_p = cout
        else:
            step = lane // math.gcd(G_out, lane)
            cout_p = -(-cout // step) * step

        w_l, g_l, b_l = w, gamma, beta
        if cin_p != cin:                           # match previous layer's channel padding
            w_l = jnp.pad(w_l, ((0, cin_p - cin), (0, 0), (0, 0), (0, 0)))
        if cout_p != cout:
            w_l = jnp.pad(w_l, ((0, 0), (0, cout_p - cout), (0, 0), (0, 0)))
            g_l = jnp.pad(g_l, (0, cout_p - cout), constant_values=1.0)
            b_l = jnp.pad(b_l, (0, cout_p - cout))

        # (Cin_p, Cout_p, s, s) -> per-pixel matmul weight, columns ordered (ki, kj, co).
        w_grp = jnp.transpose(w_l, (0, 2, 3, 1)).reshape(cin_p, ss * cout_p)
        # Block-diagonalize over the G_in incoming sub-pixel groups so the pixel
        # shuffle between layers lives in the weight, not in an in-VMEM relayout.
        w_mat = w_grp if G_in == 1 else jnp.kron(jnp.eye(G_in, dtype=w_grp.dtype), w_grp)
        w_mats.append(w_mat.astype(compute_dtype))

        g_list.append(g_l.astype(jnp.float32))
        b_list.append(b_l.astype(jnp.float32))
        meta.append((G_out, cout_p))
        strides.append(s)
        G_in, cin_p = G_out, cout_p

    # Pack all gammas/betas into ONE lane-padded slab -> a single small parameter DMA.
    gb_width = max(lane, max(-(-m[1] // lane) * lane for m in meta))
    rows = []
    for g_l, b_l in zip(g_list, b_list):
        rows.append(jnp.pad(g_l, (0, gb_width - g_l.shape[0])))
        rows.append(jnp.pad(b_l, (0, gb_width - b_l.shape[0])))
    gb_slab = jnp.stack(rows, axis=0)              # (2L, gb_width)

    c_out = int(params[-1][0].shape[1])
    return tuple(w_mats), gb_slab, tuple(meta), tuple(strides), c_out


# --------------------------------- decoder glue --------------------------------- #

def decoder_forward(x, prepped, decoder_input_size, *, eps=1e-5):
    """Matches Decoder.forward. Input/output are NCHW (PyTorch convention)."""
    w_mats, gb_slab, meta, strides, c_out = prepped
    D = decoder_input_size
    xr = x.reshape(-1, 256, D, D)                  # mirrors x.view(-1, 256, D, D)
    N = xr.shape[0]
    # NCHW -> channel-last pixel rows (n, i, j) for the fused per-pixel matmuls.
    rows = jnp.transpose(xr, (0, 2, 3, 1)).reshape(N * D * D, 256)

    y = fused_decoder_call(rows.astype(w_mats[0].dtype), w_mats, gb_slab, meta, eps=eps)

    # Single deferred spatial relayout: rows decompose as (n, i, j) and columns as
    # (k1i, k1j, ..., kLi, kLj, c) thanks to the block-diagonal weight ordering.
    L = len(meta)
    c_p = meta[-1][1]
    shape = [N, D, D]
    for s in strides:
        shape += [s, s]
    shape.append(c_p)
    y = y.reshape(shape)
    if c_p != c_out:
        y = y[..., :c_out]                         # drop lane-padded channels
    perm = ([0, 3 + 2 * L, 1] + [3 + 2 * l for l in range(L)]
            + [2] + [4 + 2 * l for l in range(L)])
    y = jnp.transpose(y, perm)
    side = D
    for s in strides:
        side *= s
    return y.reshape(N, c_out, side, side)         # NCHW


def init_decoder_params(key, color_channels, pooling_kernels):
    layer_defs = [
        (256, 128, 1),                       # m1
        (128, 64, pooling_kernels[1]),       # m2
        (64, 32, pooling_kernels[0]),        # m3
        (32, color_channels, 1),             # m4
    ]
    params = []
    for (cin, cout, s) in layer_defs:
        key, kw, kb, kg, kbt = jax.random.split(key, 5)
        fan = cin * s * s
        w = jax.random.normal(kw, (cin, cout, s, s), jnp.float32) / jnp.sqrt(fan)
        b = 0.1 * jax.random.normal(kb, (cout,), jnp.float32)
        gamma = 1.0 + 0.1 * jax.random.normal(kg, (cout,), jnp.float32)
        beta = 0.1 * jax.random.normal(kbt, (cout,), jnp.float32)
        params.append((w, b, gamma, beta, s))
    return params


# ------------------------------- pure-JAX reference ------------------------------ #

def decoder_reference(x, params, decoder_input_size):
    """Direct translation of the PyTorch module (bias included, two-pass BN)."""
    D = decoder_input_size
    out = x.reshape(-1, 256, D, D)
    for (w, b, gamma, beta, s) in params:
        y = jnp.einsum("ncij,cokl->noikjl", out, w)
        N, Co, H, _, W, _ = y.shape
        y = y.reshape(N, Co, H * s, W * s) + b[None, :, None, None]
        mean = y.mean(axis=(0, 2, 3), keepdims=True)
        var = ((y - mean) ** 2).mean(axis=(0, 2, 3), keepdims=True)
        y = (y - mean) / jnp.sqrt(var + 1e-5)
        y = y * gamma[None, :, None, None] + beta[None, :, None, None]
        out = jnp.maximum(y, 0.0)
    return out


# -------------------------------------- main ------------------------------------- #

if __name__ == "__main__":
    color_channels = 3
    pooling_kernels = (2, 2)
    decoder_input_size = 2

    key = jax.random.PRNGKey(0)
    kx, kp = jax.random.split(key)
    params = init_decoder_params(kp, color_channels, pooling_kernels)

    # NCHW input; Decoder.forward views it as (-1, 256, D, D).
    x = jax.random.normal(
        kx, (2, 256, decoder_input_size, decoder_input_size), jnp.float32
    )

    # One-time parameter prep (pad / transpose / block-diagonalize / pack), hoisted
    # out of the jitted forward.  Use compute_dtype=jnp.bfloat16 for full-rate MXU
    # on v6e/v7x (loosen the assert accordingly); f32 here for tight parity.
    prepped = prepare_decoder(params, compute_dtype=jnp.float32)

    fwd = jax.jit(lambda inp: decoder_forward(inp, prepped, decoder_input_size))
    out = jax.block_until_ready(fwd(x))

    ref = decoder_reference(x, params, decoder_input_size)
    assert out.shape == (2, color_channels, 8, 8), out.shape
    max_err = float(jnp.max(jnp.abs(out - ref)))
    assert jnp.allclose(out, ref, atol=5e-4, rtol=5e-4), max_err

    print("KERNEL_OK")
</pallas_src>

<mosaic_0001>
module attributes {stable_mosaic.version = 11 : i64} {
  func.func @_fused_decoder_kernel(%arg0: memref<8x256xf32, #tpu.memory_space<vmem>>, %arg1: memref<256x128xf32, #tpu.memory_space<vmem>>, %arg2: memref<128x256xf32, #tpu.memory_space<vmem>>, %arg3: memref<256x512xf32, #tpu.memory_space<vmem>>, %arg4: memref<512x128xf32, #tpu.memory_space<vmem>>, %arg5: memref<8x128xf32, #tpu.memory_space<vmem>>, %arg6: memref<8x128xf32, #tpu.memory_space<vmem>>) attributes {dimension_semantics = [], scalar_prefetch = 0 : i64, scratch_operands = 0 : i64, tpu.core_type = #tpu.core_type<tc>} {
    %c0 = arith.constant 0 : index
    %c0_0 = arith.constant 0 : index
    %0 = vector.load %arg0[%c0, %c0_0] : memref<8x256xf32, #tpu.memory_space<vmem>>, vector<8x256xf32>
    %c0_1 = arith.constant 0 : index
    %c0_2 = arith.constant 0 : index
    %1 = vector.load %arg1[%c0_1, %c0_2] : memref<256x128xf32, #tpu.memory_space<vmem>>, vector<256x128xf32>
    %cst = arith.constant dense<0.000000e+00> : vector<8x128xf32>
    %2 = tpu.matmul %0, %1, %cst {dimension_numbers = #tpu.dot_dimension_numbers<[1], [0], [0], [1], [0, 0, 1, 1], [], []>} : vector<8x256xf32>, vector<256x128xf32>, vector<8x128xf32> -> vector<8x128xf32>
    %cst_3 = arith.constant dense<0.000000e+00> : vector<128xf32>
    %3 = vector.multi_reduction <add>, %2, %cst_3 [0] : vector<8x128xf32> to vector<128xf32>
    %4 = vector.shape_cast %3 : vector<128xf32> to vector<1x128xf32>
    %cst_4 = arith.constant 1.250000e-01 : f32
    %5 = vector.broadcast %cst_4 : f32 to vector<1x128xf32>
    %6 = arith.mulf %4, %5 : vector<1x128xf32>
    %7 = vector.broadcast %6 : vector<1x128xf32> to vector<8x128xf32>
    %8 = arith.subf %2, %7 : vector<8x128xf32>
    %9 = arith.mulf %8, %8 : vector<8x128xf32>
    %cst_5 = arith.constant dense<0.000000e+00> : vector<128xf32>
    %10 = vector.multi_reduction <add>, %9, %cst_5 [0] : vector<8x128xf32> to vector<128xf32>
    %11 = vector.shape_cast %10 : vector<128xf32> to vector<1x128xf32>
    %cst_6 = arith.constant 1.250000e-01 : f32
    %12 = vector.broadcast %cst_6 : f32 to vector<1x128xf32>
    %13 = arith.mulf %11, %12 : vector<1x128xf32>
    %cst_7 = arith.constant 9.99999974E-6 : f32
    %14 = vector.broadcast %cst_7 : f32 to vector<1x128xf32>
    %15 = arith.addf %13, %14 : vector<1x128xf32>
    %16 = math.rsqrt %15 : vector<1x128xf32>
    %c0_8 = arith.constant 0 : index
    %c0_9 = arith.constant 0 : index
    %17 = vector.load %arg5[%c0_8, %c0_9] : memref<8x128xf32, #tpu.memory_space<vmem>>, vector<1x128xf32>
    %c1 = arith.constant 1 : index
    %c0_10 = arith.constant 0 : index
    %18 = vector.load %arg5[%c1, %c0_10] : memref<8x128xf32, #tpu.memory_space<vmem>>, vector<1x128xf32>
    %19 = arith.mulf %17, %16 : vector<1x128xf32>
    %20 = vector.broadcast %19 : vector<1x128xf32> to vector<8x128xf32>
    %21 = arith.mulf %8, %20 : vector<8x128xf32>
    %22 = vector.broadcast %18 : vector<1x128xf32> to vector<8x128xf32>
    %23 = arith.addf %21, %22 : vector<8x128xf32>
    %cst_11 = arith.constant 0.000000e+00 : f32
    %24 = vector.broadcast %cst_11 : f32 to vector<8x128xf32>
    %25 = arith.maximumf %23, %24 : vector<8x128xf32>
    %c0_12 = arith.constant 0 : index
    %c0_13 = arith.constant 0 : index
    %26 = vector.load %arg2[%c0_12, %c0_13] : memref<128x256xf32, #tpu.memory_space<vmem>>, vector<128x256xf32>
    %cst_14 = arith.constant dense<0.000000e+00> : vector<8x256xf32>
    %27 = tpu.matmul %25, %26, %cst_14 {dimension_numbers = #tpu.dot_dimension_numbers<[1], [0], [0], [1], [0, 0, 1, 1], [], []>} : vector<8x128xf32>, vector<128x256xf32>, vector<8x256xf32> -> vector<8x256xf32>
    %cst_15 = arith.constant dense<0.000000e+00> : vector<256xf32>
    %28 = vector.multi_reduction <add>, %27, %cst_15 [0] : vector<8x256xf32> to vector<256xf32>
    %29 = vector.shape_cast %28 : vector<256xf32> to vector<1x256xf32>
    %30 = vector.extract_strided_slice %29 {offsets = [0, 0], sizes = [1, 64], strides = [1, 1]} : vector<1x256xf32> to vector<1x64xf32>
    %31 = vector.extract_strided_slice %29 {offsets = [0, 64], sizes = [1, 64], strides = [1, 1]} : vector<1x256xf32> to vector<1x64xf32>
    %32 = arith.addf %30, %31 : vector<1x64xf32>
    %33 = vector.extract_strided_slice %29 {offsets = [0, 128], sizes = [1, 64], strides = [1, 1]} : vector<1x256xf32> to vector<1x64xf32>
    %34 = arith.addf %32, %33 : vector<1x64xf32>
    %35 = vector.extract_strided_slice %29 {offsets = [0, 192], sizes = [1, 64], strides = [1, 1]} : vector<1x256xf32> to vector<1x64xf32>
    %36 = arith.addf %34, %35 : vector<1x64xf32>
    %cst_16 = arith.constant 3.125000e-02 : f32
    %37 = vector.broadcast %cst_16 : f32 to vector<1x64xf32>
    %38 = arith.mulf %36, %37 : vector<1x64xf32>
    %39 = tpu.concatenate %38, %38, %38, %38 in 1 : vector<1x64xf32>, vector<1x64xf32>, vector<1x64xf32>, vector<1x64xf32> -> vector<1x256xf32>
    %40 = vector.broadcast %39 : vector<1x256xf32> to vector<8x256xf32>
    %41 = arith.subf %27, %40 : vector<8x256xf32>
    %42 = arith.mulf %41, %41 : vector<8x256xf32>
    %cst_17 = arith.constant dense<0.000000e+00> : vector<256xf32>
    %43 = vector.multi_reduction <add>, %42, %cst_17 [0] : vector<8x256xf32> to vector<256xf32>
    %44 = vector.shape_cast %43 : vector<256xf32> to vector<1x256xf32>
    %45 = vector.extract_strided_slice %44 {offsets = [0, 0], sizes = [1, 64], strides = [1, 1]} : vector<1x256xf32> to vector<1x64xf32>
    %46 = vector.extract_strided_slice %44 {offsets = [0, 64], sizes = [1, 64], strides = [1, 1]} : vector<1x256xf32> to vector<1x64xf32>
    %47 = arith.addf %45, %46 : vector<1x64xf32>
    %48 = vector.extract_strided_slice %44 {offsets = [0, 128], sizes = [1, 64], strides = [1, 1]} : vector<1x256xf32> to vector<1x64xf32>
    %49 = arith.addf %47, %48 : vector<1x64xf32>
    %50 = vector.extract_strided_slice %44 {offsets = [0, 192], sizes = [1, 64], strides = [1, 1]} : vector<1x256xf32> to vector<1x64xf32>
    %51 = arith.addf %49, %50 : vector<1x64xf32>
    %cst_18 = arith.constant 3.125000e-02 : f32
    %52 = vector.broadcast %cst_18 : f32 to vector<1x64xf32>
    %53 = arith.mulf %51, %52 : vector<1x64xf32>
    %cst_19 = arith.constant 9.99999974E-6 : f32
    %54 = vector.broadcast %cst_19 : f32 to vector<1x64xf32>
    %55 = arith.addf %53, %54 : vector<1x64xf32>
    %56 = math.rsqrt %55 : vector<1x64xf32>
    %c2 = arith.constant 2 : index
    %c0_20 = arith.constant 0 : index
    %57 = vector.load %arg5[%c2, %c0_20] : memref<8x128xf32, #tpu.memory_space<vmem>>, vector<1x64xf32>
    %c3 = arith.constant 3 : index
    %c0_21 = arith.constant 0 : index
    %58 = vector.load %arg5[%c3, %c0_21] : memref<8x128xf32, #tpu.memory_space<vmem>>, vector<1x64xf32>
    %59 = arith.mulf %57, %56 : vector<1x64xf32>
    %60 = tpu.concatenate %59, %59, %59, %59 in 1 : vector<1x64xf32>, vector<1x64xf32>, vector<1x64xf32>, vector<1x64xf32> -> vector<1x256xf32>
    %61 = tpu.concatenate %58, %58, %58, %58 in 1 : vector<1x64xf32>, vector<1x64xf32>, vector<1x64xf32>, vector<1x64xf32> -> vector<1x256xf32>
    %62 = vector.broadcast %60 : vector<1x256xf32> to vector<8x256xf32>
    %63 = arith.mulf %41, %62 : vector<8x256xf32>
    %64 = vector.broadcast %61 : vector<1x256xf32> to vector<8x256xf32>
    %65 = arith.addf %63, %64 : vector<8x256xf32>
    %cst_22 = arith.constant 0.000000e+00 : f32
    %66 = vector.broadcast %cst_22 : f32 to vector<8x256xf32>
    %67 = arith.maximumf %65, %66 : vector<8x256xf32>
    %c0_23 = arith.constant 0 : index
    %c0_24 = arith.constant 0 : index
    %68 = vector.load %arg3[%c0_23, %c0_24] : memref<256x512xf32, #tpu.memory_space<vmem>>, vector<256x512xf32>
    %cst_25 = arith.constant dense<0.000000e+00> : vector<8x512xf32>
    %69 = tpu.matmul %67, %68, %cst_25 {dimension_numbers = #tpu.dot_dimension_numbers<[1], [0], [0], [1], [0, 0, 1, 1], [], []>} : vector<8x256xf32>, vector<256x512xf32>, vector<8x512xf32> -> vector<8x512xf32>
    %cst_26 = arith.constant dense<0.000000e+00> : vector<512xf32>
    %70 = vector.multi_reduction <add>, %69, %cst_26 [0] : vector<8x512xf32> to vector<512xf32>
    %71 = vector.shape_cast %70 : vector<512xf32> to vector<1x512xf32>
    %72 = vector.extract_strided_slice %71 {offsets = [0, 0], sizes = [1, 32], strides = [1, 1]} : vector<1x512xf32> to vector<1x32xf32>
    %73 = vector.extract_strided_slice %71 {offsets = [0, 32], sizes = [1, 32], strides = [1, 1]} : vector<1x512xf32> to vector<1x32xf32>
    %74 = arith.addf %72, %73 : vector<1x32xf32>
    %75 = vector.extract_strided_slice %71 {offsets = [0, 64], sizes = [1, 32], strides = [1, 1]} : vector<1x512xf32> to vector<1x32xf32>
    %76 = arith.addf %74, %75 : vector<1x32xf32>
    %77 = vector.extract_strided_slice %71 {offsets = [0, 96], sizes = [1, 32], strides = [1, 1]} : vector<1x512xf32> to vector<1x32xf32>
    %78 = arith.addf %76, %77 : vector<1x32xf32>
    %79 = vector.extract_strided_slice %71 {offsets = [0, 128], sizes = [1, 32], strides = [1, 1]} : vector<1x512xf32> to vector<1x32xf32>
    %80 = arith.addf %78, %79 : vector<1x32xf32>
    %81 = vector.extract_strided_slice %71 {offsets = [0, 160], sizes = [1, 32], strides = [1, 1]} : vector<1x512xf32> to vector<1x32xf32>
    %82 = arith.addf %80, %81 : vector<1x32xf32>
    %83 = vector.extract_strided_slice %71 {offsets = [0, 192], sizes = [1, 32], strides = [1, 1]} : vector<1x512xf32> to vector<1x32xf32>
    %84 = arith.addf %82, %83 : vector<1x32xf32>
    %85 = vector.extract_strided_slice %71 {offsets = [0, 224], sizes = [1, 32], strides = [1, 1]} : vector<1x512xf32> to vector<1x32xf32>
    %86 = arith.addf %84, %85 : vector<1x32xf32>
    %87 = vector.extract_strided_slice %71 {offsets = [0, 256], sizes = [1, 32], strides = [1, 1]} : vector<1x512xf32> to vector<1x32xf32>
    %88 = arith.addf %86, %87 : vector<1x32xf32>
    %89 = vector.extract_strided_slice %71 {offsets = [0, 288], sizes = [1, 32], strides = [1, 1]} : vector<1x512xf32> to vector<1x32xf32>
    %90 = arith.addf %88, %89 : vector<1x32xf32>
    %91 = vector.extract_strided_slice %71 {offsets = [0, 320], sizes = [1, 32], strides = [1, 1]} : vector<1x512xf32> to vector<1x32xf32>
    %92 = arith.addf %90, %91 : vector<1x32xf32>
    %93 = vector.extract_strided_slice %71 {offsets = [0, 352], sizes = [1, 32], strides = [1, 1]} : vector<1x512xf32> to vector<1x32xf32>
    %94 = arith.addf %92, %93 : vector<1x32xf32>
    %95 = vector.extract_strided_slice %71 {offsets = [0, 384], sizes = [1, 32], strides = [1, 1]} : vector<1x512xf32> to vector<1x32xf32>
    %96 = arith.addf %94, %95 : vector<1x32xf32>
    %97 = vector.extract_strided_slice %71 {offsets = [0, 416], sizes = [1, 32], strides = [1, 1]} : vector<1x512xf32> to vector<1x32xf32>
    %98 = arith.addf %96, %97 : vector<1x32xf32>
    %99 = vector.extract_strided_slice %71 {offsets = [0, 448], sizes = [1, 32], strides = [1, 1]} : vector<1x512xf32> to vector<1x32xf32>
    %100 = arith.addf %98, %99 : vector<1x32xf32>
    %101 = vector.extract_strided_slice %71 {offsets = [0, 480], sizes = [1, 32], strides = [1, 1]} : vector<1x512xf32> to vector<1x32xf32>
    %102 = arith.addf %100, %101 : vector<1x32xf32>
    %cst_27 = arith.constant 7.812500e-03 : f32
    %103 = vector.broadcast %cst_27 : f32 to vector<1x32xf32>
    %104 = arith.mulf %102, %103 : vector<1x32xf32>
    %105 = tpu.concatenate %104, %104, %104, %104, %104, %104, %104, %104, %104, %104, %104, %104, %104, %104, %104, %104 in 1 : vector<1x32xf32>, vector<1x32xf32>, vector<1x32xf32>, vector<1x32xf32>, vector<1x32xf32>, vector<1x32xf32>, vector<1x32xf32>, vector<1x32xf32>, vector<1x32xf32>, vector<1x32xf32>, vector<1x32xf32>, vector<1x32xf32>, vector<1x32xf32>, vector<1x32xf32>, vector<1x32xf32>, vector<1x32xf32> -> vector<1x512xf32>
    %106 = vector.broadcast %105 : vector<1x512xf32> to vector<8x512xf32>
    %107 = arith.subf %69, %106 : vector<8x512xf32>
    %108 = arith.mulf %107, %107 : vector<8x512xf32>
    %cst_28 = arith.constant dense<0.000000e+00> : vector<512xf32>
    %109 = vector.multi_reduction <add>, %108, %cst_28 [0] : vector<8x512xf32> to vector<512xf32>
    %110 = vector.shape_cast %109 : vector<512xf32> to vector<1x512xf32>
    %111 = vector.extract_strided_slice %110 {offsets = [0, 0], sizes = [1, 32], strides = [1, 1]} : vector<1x512xf32> to vector<1x32xf32>
    %112 = vector.extract_strided_slice %110 {offsets = [0, 32], sizes = [1, 32], strides = [1, 1]} : vector<1x512xf32> to vector<1x32xf32>
    %113 = arith.addf %111, %112 : vector<1x32xf32>
    %114 = vector.extract_strided_slice %110 {offsets = [0, 64], sizes = [1, 32], strides = [1, 1]} : vector<1x512xf32> to vector<1x32xf32>
    %115 = arith.addf %113, %114 : vector<1x32xf32>
    %116 = vector.extract_strided_slice %110 {offsets = [0, 96], sizes = [1, 32], strides = [1, 1]} : vector<1x512xf32> to vector<1x32xf32>
    %117 = arith.addf %115, %116 : vector<1x32xf32>
    %118 = vector.extract_strided_slice %110 {offsets = [0, 128], sizes = [1, 32], strides = [1, 1]} : vector<1x512xf32> to vector<1x32xf32>
    %119 = arith.addf %117, %118 : vector<1x32xf32>
    %120 = vector.extract_strided_slice %110 {offsets = [0, 160], sizes = [1, 32], strides = [1, 1]} : vector<1x512xf32> to vector<1x32xf32>
    %121 = arith.addf %119, %120 : vector<1x32xf32>
    %122 = vector.extract_strided_slice %110 {offsets = [0, 192], sizes = [1, 32], strides = [1, 1]} : vector<1x512xf32> to vector<1x32xf32>
    %123 = arith.addf %121, %122 : vector<1x32xf32>
    %124 = vector.extract_strided_slice %110 {offsets = [0, 224], sizes = [1, 32], strides = [1, 1]} : vector<1x512xf32> to vector<1x32xf32>
    %125 = arith.addf %123, %124 : vector<1x32xf32>
    %126 = vector.extract_strided_slice %110 {offsets = [0, 256], sizes = [1, 32], strides = [1, 1]} : vector<1x512xf32> to vector<1x32xf32>
    %127 = arith.addf %125, %126 : vector<1x32xf32>
    %128 = vector.extract_strided_slice %110 {offsets = [0, 288], sizes = [1, 32], strides = [1, 1]} : vector<1x512xf32> to vector<1x32xf32>
    %129 = arith.addf %127, %128 : vector<1x32xf32>
    %130 = vector.extract_strided_slice %110 {offsets = [0, 320], sizes = [1, 32], strides = [1, 1]} : vector<1x512xf32> to vector<1x32xf32>
    %131 = arith.addf %129, %130 : vector<1x32xf32>
    %132 = vector.extract_strided_slice %110 {offsets = [0, 352], sizes = [1, 32], strides = [1, 1]} : vector<1x512xf32> to vector<1x32xf32>
    %133 = arith.addf %131, %132 : vector<1x32xf32>
    %134 = vector.extract_strided_slice %110 {offsets = [0, 384], sizes = [1, 32], strides = [1, 1]} : vector<1x512xf32> to vector<1x32xf32>
    %135 = arith.addf %133, %134 : vector<1x32xf32>
    %136 = vector.extract_strided_slice %110 {offsets = [0, 416], sizes = [1, 32], strides = [1, 1]} : vector<1x512xf32> to vector<1x32xf32>
    %137 = arith.addf %135, %136 : vector<1x32xf32>
    %138 = vector.extract_strided_slice %110 {offsets = [0, 448], sizes = [1, 32], strides = [1, 1]} : vector<1x512xf32> to vector<1x32xf32>
    %139 = arith.addf %137, %138 : vector<1x32xf32>
    %140 = vector.extract_strided_slice %110 {offsets = [0, 480], sizes = [1, 32], strides = [1, 1]} : vector<1x512xf32> to vector<1x32xf32>
    %141 = arith.addf %139, %140 : vector<1x32xf32>
    %cst_29 = arith.constant 7.812500e-03 : f32
    %142 = vector.broadcast %cst_29 : f32 to vector<1x32xf32>
    %143 = arith.mulf %141, %142 : vector<1x32xf32>
    %cst_30 = arith.constant 9.99999974E-6 : f32
    %144 = vector.broadcast %cst_30 : f32 to vector<1x32xf32>
    %145 = arith.addf %143, %144 : vector<1x32xf32>
    %146 = math.rsqrt %145 : vector<1x32xf32>
    %c4 = arith.constant 4 : index
    %c0_31 = arith.constant 0 : index
    %147 = vector.load %arg5[%c4, %c0_31] : memref<8x128xf32, #tpu.memory_space<vmem>>, vector<1x32xf32>
    %c5 = arith.constant 5 : index
    %c0_32 = arith.constant 0 : index
    %148 = vector.load %arg5[%c5, %c0_32] : memref<8x128xf32, #tpu.memory_space<vmem>>, vector<1x32xf32>
    %149 = arith.mulf %147, %146 : vector<1x32xf32>
    %150 = tpu.concatenate %149, %149, %149, %149, %149, %149, %149, %149, %149, %149, %149, %149, %149, %149, %149, %149 in 1 : vector<1x32xf32>, vector<1x32xf32>, vector<1x32xf32>, vector<1x32xf32>, vector<1x32xf32>, vector<1x32xf32>, vector<1x32xf32>, vector<1x32xf32>, vector<1x32xf32>, vector<1x32xf32>, vector<1x32xf32>, vector<1x32xf32>, vector<1x32xf32>, vector<1x32xf32>, vector<1x32xf32>, vector<1x32xf32> -> vector<1x512xf32>
    %151 = tpu.concatenate %148, %148, %148, %148, %148, %148, %148, %148, %148, %148, %148, %148, %148, %148, %148, %148 in 1 : vector<1x32xf32>, vector<1x32xf32>, vector<1x32xf32>, vector<1x32xf32>, vector<1x32xf32>, vector<1x32xf32>, vector<1x32xf32>, vector<1x32xf32>, vector<1x32xf32>, vector<1x32xf32>, vector<1x32xf32>, vector<1x32xf32>, vector<1x32xf32>, vector<1x32xf32>, vector<1x32xf32>, vector<1x32xf32> -> vector<1x512xf32>
    %152 = vector.broadcast %150 : vector<1x512xf32> to vector<8x512xf32>
    %153 = arith.mulf %107, %152 : vector<8x512xf32>
    %154 = vector.broadcast %151 : vector<1x512xf32> to vector<8x512xf32>
    %155 = arith.addf %153, %154 : vector<8x512xf32>
    %cst_33 = arith.constant 0.000000e+00 : f32
    %156 = vector.broadcast %cst_33 : f32 to vector<8x512xf32>
    %157 = arith.maximumf %155, %156 : vector<8x512xf32>
    %c0_34 = arith.constant 0 : index
    %c0_35 = arith.constant 0 : index
    %158 = vector.load %arg4[%c0_34, %c0_35] : memref<512x128xf32, #tpu.memory_space<vmem>>, vector<512x128xf32>
    %cst_36 = arith.constant dense<0.000000e+00> : vector<8x128xf32>
    %159 = tpu.matmul %157, %158, %cst_36 {dimension_numbers = #tpu.dot_dimension_numbers<[1], [0], [0], [1], [0, 0, 1, 1], [], []>} : vector<8x512xf32>, vector<512x128xf32>, vector<8x128xf32> -> vector<8x128xf32>
    %cst_37 = arith.constant dense<0.000000e+00> : vector<128xf32>
    %160 = vector.multi_reduction <add>, %159, %cst_37 [0] : vector<8x128xf32> to vector<128xf32>
    %161 = vector.shape_cast %160 : vector<128xf32> to vector<1x128xf32>
    %162 = vector.extract_strided_slice %161 {offsets = [0, 0], sizes = [1, 8], strides = [1, 1]} : vector<1x128xf32> to vector<1x8xf32>
    %163 = vector.extract_strided_slice %161 {offsets = [0, 8], sizes = [1, 8], strides = [1, 1]} : vector<1x128xf32> to vector<1x8xf32>
    %164 = arith.addf %162, %163 : vector<1x8xf32>
    %165 = vector.extract_strided_slice %161 {offsets = [0, 16], sizes = [1, 8], strides = [1, 1]} : vector<1x128xf32> to vector<1x8xf32>
    %166 = arith.addf %164, %165 : vector<1x8xf32>
    %167 = vector.extract_strided_slice %161 {offsets = [0, 24], sizes = [1, 8], strides = [1, 1]} : vector<1x128xf32> to vector<1x8xf32>
    %168 = arith.addf %166, %167 : vector<1x8xf32>
    %169 = vector.extract_strided_slice %161 {offsets = [0, 32], sizes = [1, 8], strides = [1, 1]} : vector<1x128xf32> to vector<1x8xf32>
    %170 = arith.addf %168, %169 : vector<1x8xf32>
    %171 = vector.extract_strided_slice %161 {offsets = [0, 40], sizes = [1, 8], strides = [1, 1]} : vector<1x128xf32> to vector<1x8xf32>
    %172 = arith.addf %170, %171 : vector<1x8xf32>
    %173 = vector.extract_strided_slice %161 {offsets = [0, 48], sizes = [1, 8], strides = [1, 1]} : vector<1x128xf32> to vector<1x8xf32>
    %174 = arith.addf %172, %173 : vector<1x8xf32>
    %175 = vector.extract_strided_slice %161 {offsets = [0, 56], sizes = [1, 8], strides = [1, 1]} : vector<1x128xf32> to vector<1x8xf32>
    %176 = arith.addf %174, %175 : vector<1x8xf32>
    %177 = vector.extract_strided_slice %161 {offsets = [0, 64], sizes = [1, 8], strides = [1, 1]} : vector<1x128xf32> to vector<1x8xf32>
    %178 = arith.addf %176, %177 : vector<1x8xf32>
    %179 = vector.extract_strided_slice %161 {offsets = [0, 72], sizes = [1, 8], strides = [1, 1]} : vector<1x128xf32> to vector<1x8xf32>
    %180 = arith.addf %178, %179 : vector<1x8xf32>
    %181 = vector.extract_strided_slice %161 {offsets = [0, 80], sizes = [1, 8], strides = [1, 1]} : vector<1x128xf32> to vector<1x8xf32>
    %182 = arith.addf %180, %181 : vector<1x8xf32>
    %183 = vector.extract_strided_slice %161 {offsets = [0, 88], sizes = [1, 8], strides = [1, 1]} : vector<1x128xf32> to vector<1x8xf32>
    %184 = arith.addf %182, %183 : vector<1x8xf32>
    %185 = vector.extract_strided_slice %161 {offsets = [0, 96], sizes = [1, 8], strides = [1, 1]} : vector<1x128xf32> to vector<1x8xf32>
    %186 = arith.addf %184, %185 : vector<1x8xf32>
    %187 = vector.extract_strided_slice %161 {offsets = [0, 104], sizes = [1, 8], strides = [1, 1]} : vector<1x128xf32> to vector<1x8xf32>
    %188 = arith.addf %186, %187 : vector<1x8xf32>
    %189 = vector.extract_strided_slice %161 {offsets = [0, 112], sizes = [1, 8], strides = [1, 1]} : vector<1x128xf32> to vector<1x8xf32>
    %190 = arith.addf %188, %189 : vector<1x8xf32>
    %191 = vector.extract_strided_slice %161 {offsets = [0, 120], sizes = [1, 8], strides = [1, 1]} : vector<1x128xf32> to vector<1x8xf32>
    %192 = arith.addf %190, %191 : vector<1x8xf32>
    %cst_38 = arith.constant 7.812500e-03 : f32
    %193 = vector.broadcast %cst_38 : f32 to vector<1x8xf32>
    %194 = arith.mulf %192, %193 : vector<1x8xf32>
    %195 = tpu.concatenate %194, %194, %194, %194, %194, %194, %194, %194, %194, %194, %194, %194, %194, %194, %194, %194 in 1 : vector<1x8xf32>, vector<1x8xf32>, vector<1x8xf32>, vector<1x8xf32>, vector<1x8xf32>, vector<1x8xf32>, vector<1x8xf32>, vector<1x8xf32>, vector<1x8xf32>, vector<1x8xf32>, vector<1x8xf32>, vector<1x8xf32>, vector<1x8xf32>, vector<1x8xf32>, vector<1x8xf32>, vector<1x8xf32> -> vector<1x128xf32>
    %196 = vector.broadcast %195 : vector<1x128xf32> to vector<8x128xf32>
    %197 = arith.subf %159, %196 : vector<8x128xf32>
    %198 = arith.mulf %197, %197 : vector<8x128xf32>
    %cst_39 = arith.constant dense<0.000000e+00> : vector<128xf32>
    %199 = vector.multi_reduction <add>, %198, %cst_39 [0] : vector<8x128xf32> to vector<128xf32>
    %200 = vector.shape_cast %199 : vector<128xf32> to vector<1x128xf32>
    %201 = vector.extract_strided_slice %200 {offsets = [0, 0], sizes = [1, 8], strides = [1, 1]} : vector<1x128xf32> to vector<1x8xf32>
    %202 = vector.extract_strided_slice %200 {offsets = [0, 8], sizes = [1, 8], strides = [1, 1]} : vector<1x128xf32> to vector<1x8xf32>
    %203 = arith.addf %201, %202 : vector<1x8xf32>
    %204 = vector.extract_strided_slice %200 {offsets = [0, 16], sizes = [1, 8], strides = [1, 1]} : vector<1x128xf32> to vector<1x8xf32>
    %205 = arith.addf %203, %204 : vector<1x8xf32>
    %206 = vector.extract_strided_slice %200 {offsets = [0, 24], sizes = [1, 8], strides = [1, 1]} : vector<1x128xf32> to vector<1x8xf32>
    %207 = arith.addf %205, %206 : vector<1x8xf32>
    %208 = vector.extract_strided_slice %200 {offsets = [0, 32], sizes = [1, 8], strides = [1, 1]} : vector<1x128xf32> to vector<1x8xf32>
    %209 = arith.addf %207, %208 : vector<1x8xf32>
    %210 = vector.extract_strided_slice %200 {offsets = [0, 40], sizes = [1, 8], strides = [1, 1]} : vector<1x128xf32> to vector<1x8xf32>
    %211 = arith.addf %209, %210 : vector<1x8xf32>
    %212 = vector.extract_strided_slice %200 {offsets = [0, 48], sizes = [1, 8], strides = [1, 1]} : vector<1x128xf32> to vector<1x8xf32>
    %213 = arith.addf %211, %212 : vector<1x8xf32>
    %214 = vector.extract_strided_slice %200 {offsets = [0, 56], sizes = [1, 8], strides = [1, 1]} : vector<1x128xf32> to vector<1x8xf32>
    %215 = arith.addf %213, %214 : vector<1x8xf32>
    %216 = vector.extract_strided_slice %200 {offsets = [0, 64], sizes = [1, 8], strides = [1, 1]} : vector<1x128xf32> to vector<1x8xf32>
    %217 = arith.addf %215, %216 : vector<1x8xf32>
    %218 = vector.extract_strided_slice %200 {offsets = [0, 72], sizes = [1, 8], strides = [1, 1]} : vector<1x128xf32> to vector<1x8xf32>
    %219 = arith.addf %217, %218 : vector<1x8xf32>
    %220 = vector.extract_strided_slice %200 {offsets = [0, 80], sizes = [1, 8], strides = [1, 1]} : vector<1x128xf32> to vector<1x8xf32>
    %221 = arith.addf %219, %220 : vector<1x8xf32>
    %222 = vector.extract_strided_slice %200 {offsets = [0, 88], sizes = [1, 8], strides = [1, 1]} : vector<1x128xf32> to vector<1x8xf32>
    %223 = arith.addf %221, %222 : vector<1x8xf32>
    %224 = vector.extract_strided_slice %200 {offsets = [0, 96], sizes = [1, 8], strides = [1, 1]} : vector<1x128xf32> to vector<1x8xf32>
    %225 = arith.addf %223, %224 : vector<1x8xf32>
    %226 = vector.extract_strided_slice %200 {offsets = [0, 104], sizes = [1, 8], strides = [1, 1]} : vector<1x128xf32> to vector<1x8xf32>
    %227 = arith.addf %225, %226 : vector<1x8xf32>
    %228 = vector.extract_strided_slice %200 {offsets = [0, 112], sizes = [1, 8], strides = [1, 1]} : vector<1x128xf32> to vector<1x8xf32>
    %229 = arith.addf %227, %228 : vector<1x8xf32>
    %230 = vector.extract_strided_slice %200 {offsets = [0, 120], sizes = [1, 8], strides = [1, 1]} : vector<1x128xf32> to vector<1x8xf32>
    %231 = arith.addf %229, %230 : vector<1x8xf32>
    %cst_40 = arith.constant 7.812500e-03 : f32
    %232 = vector.broadcast %cst_40 : f32 to vector<1x8xf32>
    %233 = arith.mulf %231, %232 : vector<1x8xf32>
    %cst_41 = arith.constant 9.99999974E-6 : f32
    %234 = vector.broadcast %cst_41 : f32 to vector<1x8xf32>
    %235 = arith.addf %233, %234 : vector<1x8xf32>
    %236 = math.rsqrt %235 : vector<1x8xf32>
    %c6 = arith.constant 6 : index
    %c0_42 = arith.constant 0 : index
    %237 = vector.load %arg5[%c6, %c0_42] : memref<8x128xf32, #tpu.memory_space<vmem>>, vector<1x8xf32>
    %c7 = arith.constant 7 : index
    %c0_43 = arith.constant 0 : index
    %238 = vector.load %arg5[%c7, %c0_43] : memref<8x128xf32, #tpu.memory_space<vmem>>, vector<1x8xf32>
    %239 = arith.mulf %237, %236 : vector<1x8xf32>
    %240 = tpu.concatenate %239, %239, %239, %239, %239, %239, %239, %239, %239, %239, %239, %239, %239, %239, %239, %239 in 1 : vector<1x8xf32>, vector<1x8xf32>, vector<1x8xf32>, vector<1x8xf32>, vector<1x8xf32>, vector<1x8xf32>, vector<1x8xf32>, vector<1x8xf32>, vector<1x8xf32>, vector<1x8xf32>, vector<1x8xf32>, vector<1x8xf32>, vector<1x8xf32>, vector<1x8xf32>, vector<1x8xf32>, vector<1x8xf32> -> vector<1x128xf32>
    %241 = tpu.concatenate %238, %238, %238, %238, %238, %238, %238, %238, %238, %238, %238, %238, %238, %238, %238, %238 in 1 : vector<1x8xf32>, vector<1x8xf32>, vector<1x8xf32>, vector<1x8xf32>, vector<1x8xf32>, vector<1x8xf32>, vector<1x8xf32>, vector<1x8xf32>, vector<1x8xf32>, vector<1x8xf32>, vector<1x8xf32>, vector<1x8xf32>, vector<1x8xf32>, vector<1x8xf32>, vector<1x8xf32>, vector<1x8xf32> -> vector<1x128xf32>
    %242 = vector.broadcast %240 : vector<1x128xf32> to vector<8x128xf32>
    %243 = arith.mulf %197, %242 : vector<8x128xf32>
    %244 = vector.broadcast %241 : vector<1x128xf32> to vector<8x128xf32>
    %245 = arith.addf %243, %244 : vector<8x128xf32>
    %cst_44 = arith.constant 0.000000e+00 : f32
    %246 = vector.broadcast %cst_44 : f32 to vector<8x128xf32>
    %247 = arith.maximumf %245, %246 : vector<8x128xf32>
    %c0_45 = arith.constant 0 : index
    %c0_46 = arith.constant 0 : index
    %248 = vector.load %arg6[%c0_45, %c0_46] : memref<8x128xf32, #tpu.memory_space<vmem>>, vector<8x128xf32>
    tpu.vector_store %arg6[%c0_45, %c0_46], %247 {strides = array<i32>} : memref<8x128xf32, #tpu.memory_space<vmem>>, vector<8x128xf32>,
    return
  }
}

</mosaic_0001>

<bundles_post_ra>
// kernel: _lambda_.1
= control target key start
LH: loop header
LB: loop body
LE: loop exit
PB: predicated region body
PF: predicated region fallthrough
CT: control target
= control target key end

     0   :  { %11 = vsyncpa [#allocation3], 0  ;;  %s2115_s0 = inlined_call_operand.vmem [shape: f32[8,256], index: 0, kind: input, shape index: {}]   ;;  %s2116_s1 = inlined_call_operand.hbm [shape: f32[256,128], index: 1, kind: input, shape index: {}]   ;;  %s2117_s2 = inlined_call_operand.hbm [shape: f32[128,256], index: 2, kind: input, shape index: {}]   ;;  %s2118_s3 = inlined_call_operand.hbm [shape: f32[256,512], index: 3, kind: input, shape index: {}]   ;;  %s2119_s4 = inlined_call_operand.hbm [shape: f32[512,128], index: 4, kind: input, shape index: {}]   ;;  %s2120_s5 = inlined_call_operand.vmem [shape: f32[8,128], index: 5, kind: input, shape index: {}]   ;;  %s2121_s6 = inlined_call_operand.vmem [shape: f32[8,128], index: 6, kind: output, shape index: {}]  }
   0x1   :  { %12 = vsyncpa [#allocation5], 0 }
   0x2   :  { %13 = vsyncpa [#allocation8], 0  ;;  %s1704_s21 = smov [#allocation4]  }
   0x3   :  { %s33_s22 = sshll.u32 %s1704_s21, 4  ;;  %s34_s22 = int_to_ptr.vmem [resolvable:$true] %s33_s22 }
   0x4   :  { %s1626_s23 = scalar_lea.vmem %s34_s22, 4096  ;;  %p1631_p1 = scmp.lt.s32.totalorder %s34_s22, %s34_s22 }
   0x5   :  { %p1627_p0 = scmp.ne.s32.totalorder %s34_s22, %s1626_s23  ;;  %p1632_p2 = scmp.lt.s32.totalorder %s1626_s23, %s1626_s23 }
   0x7   :  { %p1633_p3 = por %p1632_p2, %p1631_p1 }
   0x9   :  { %p1634_p4 = pnand %p1633_p3, %p1627_p0 }
   0xb   :  { %1637 = shalt.err (!%p1634_p4)
}
   0xc   :  { %s1705_s24 = smov 256   ;;  %s1706_s25 = smov 16  }
   0xd   :  { %39 = dma.hbm_to_vmem [thread:$0]  %s2117_s2, 4096, %s34_s22, [#allocation5], %s1705_s24, %s1705_s24, %s1706_s25  }
   0xe   :  { %s1707_s28 = smov [#allocation2]  }
   0xf   :  { %s21_s29 = sshll.u32 %s1707_s28, 4  ;;  %s22_s29 = int_to_ptr.vmem [resolvable:$true] %s21_s29 }
  0x10   :  { %s1646_s30 = scalar_lea.vmem %s22_s29, 4096  ;;  %p1651_p6 = scmp.lt.s32.totalorder %s22_s29, %s22_s29 }
  0x11   :  { %p1647_p5 = scmp.ne.s32.totalorder %s22_s29, %s1646_s30  ;;  %p1652_p7 = scmp.lt.s32.totalorder %s1646_s30, %s1646_s30 }
  0x13   :  { %p1653_p8 = por %p1652_p7, %p1651_p6 }
  0x15   :  { %p1654_p9 = pnand %p1653_p8, %p1647_p5 }
  0x17   :  { %1657 = shalt.err (!%p1654_p9)
}
  0x18   :  { %s1708_s7 = smov 128   ;;  %s1709_s8 = smov 8  }
  0x19   :  { %27 = dma.hbm_to_vmem [thread:$0]  %s2116_s1, 4096, %s22_s29, [#allocation3], %s1708_s7, %s1708_s7, %s1709_s8  }
  0x1a   :  { %s1710_s11 = smov [#allocation6]  }
  0x1b   :  { %s45_s12 = sshll.u32 %s1710_s11, 4  ;;  %s46_s12 = int_to_ptr.vmem [resolvable:$true] %s45_s12 }
  0x1c   :  { %s1666_s2 = scalar_lea.vmem %s46_s12, 16384  ;;  %p1671_p11 = scmp.lt.s32.totalorder %s46_s12, %s46_s12 }
  0x1d   :  { %p1667_p10 = scmp.ne.s32.totalorder %s46_s12, %s1666_s2  ;;  %p1672_p12 = scmp.lt.s32.totalorder %s1666_s2, %s1666_s2 }
  0x1f   :  { %p1673_p13 = por %p1672_p12, %p1671_p11 }
  0x21   :  { %p1674_p0 = pnand %p1673_p13, %p1667_p10 }
  0x23   :  { %1677 = shalt.err (!%p1674_p0)
}
  0x24   :  { %s1711_s13 = smov 512   ;;  %s1712_s14 = smov 32  }
  0x25   :  { %51 = dma.hbm_to_vmem [thread:$0]  %s2118_s3, 16384, %s46_s12, [#allocation5], %s1711_s13, %s1711_s13, %s1712_s14  }
  0x26   :  { %s1713_s17 = smov [#allocation7]  }
  0x27   :  { %s57_s18 = sshll.u32 %s1713_s17, 4  ;;  %s58_s18 = int_to_ptr.vmem [resolvable:$true] %s57_s18 }
  0x28   :  { %s1686_s1 = scalar_lea.vmem %s58_s18, 8192  ;;  %p1691_p2 = scmp.lt.s32.totalorder %s58_s18, %s58_s18 }
  0x29   :  { %p1687_p1 = scmp.ne.s32.totalorder %s58_s18, %s1686_s1  ;;  %p1692_p3 = scmp.lt.s32.totalorder %s1686_s1, %s1686_s1 }
  0x2b   :  { %p1693_p4 = por %p1692_p3, %p1691_p2 }
  0x2d   :  { %p1694_p5 = pnand %p1693_p4, %p1687_p1 }
  0x2f   :  { %1697 = shalt.err (!%p1694_p5)
}
  0x30   :  { %63 = dma.hbm_to_vmem [thread:$0]  %s2119_s4, 8192, %s58_s18, [#allocation8], %s1708_s7, %s1708_s7, %s1709_s8  }
  0x31   :  { %1698 = dma.done.wait [#allocation3], 4096  }
  0x32   :  { %1699 = vsyncadd [#allocation3], 4294963200 }
  0x33   :  { %1700 = dma.done.wait [#allocation5], 20480  }
  0x34   :  { %1701 = vsyncadd [#allocation5], 4294946816 }
  0x35   :  { %1702 = dma.done.wait [#allocation8], 8192  }
  0x36   :  { %1703 = vsyncadd [#allocation8], 4294959104  ;;  %v111_v0 = vld [vmem:[#allocation2 + $0xf8] sm:$0xff]  ;;  %v110_v2 = vld [vmem:[#allocation2 + $0xf0] sm:$0xff]  ;;  %v1714_v47 = vmov 0.0   ;;  %s1715_s27 = smov 64  }
  0x37   :  { %v95_v1 = vld [vmem:[#allocation2 + $0x78] sm:$0xff]  ;;  %1482 = vmatprep.subr.mxu0 %v111_v0  ;;  %v94_v3 = vld [vmem:[#allocation2 + $0x70] sm:$0xff]  ;;  %v109_v4 = vld [vmem:[#allocation2 + $0xe8] sm:$0xff]  ;;  %310 = vmatprep.mubr.f32.mxu1 %v1714_v47  ;;  %vm345_vm0 = vcmask 523264   ;;  %s1716_s9 = smov 96   ;;  %vm768_vm1 = vcmask 261120  }
  0x38   :  { %1483 = vmatpush3.msra.mxu0 %v95_v1  ;;  %v93_v5 = vld [vmem:[#allocation2 + $0x68] sm:$0xff]  ;;  %v108_v6 = vld [vmem:[#allocation2 + $0xe0] sm:$0xff]  ;;  %v107_v8 = vld [vmem:[#allocation2 + $0xd8] sm:$0xff]  ;;  %vm771_vm2 = vcmask 785408   ;;  %s1717_s13 = smov 112   ;;  %s1718_s15 = smov 120  }
  0x39   :  { %1484 = vmatprep.subr.mxu0 %v110_v2  ;;  %v92_v7 = vld [vmem:[#allocation2 + $0x60] sm:$0xff]  ;;  %v91_v9 = vld [vmem:[#allocation2 + $0x58] sm:$0xff]  ;;  %v106_v10 = vld [vmem:[#allocation2 + $0xd0] sm:$0xff]  ;;  %s1719_s16 = smov 104   ;;  %s1720_s17 = smov 80   ;;  %vm1234_vm3 = vcmask 64512  }
  0x3a   :  { %1485 = vmatpush3.msra.mxu0 %v94_v3  ;;  %v90_v11 = vld [vmem:[#allocation2 + $0x50] sm:$0xff]  ;;  %v105_v12 = vld [vmem:[#allocation2 + $0xc8] sm:$0xff]  ;;  %v104_v15 = vld [vmem:[#allocation2 + $0xc0] sm:$0xff]  ;;  %s1721_s18 = smov 88   ;;  %s1722_s1 = smov 72   ;;  %vm1236_vm4 = vcmask 130048  }
  0x3b   :  { %1486 = vmatprep.subr.mxu0 %v109_v4  ;;  %v79_v13 = vld [vmem:[%s2115_s0 + $0x8] sm:$0xff]  ;;  %v88_v16 = vld [vmem:[#allocation2 + $0x40] sm:$0xff]  ;;  %v103_v17 = vld [vmem:[#allocation2 + $0xb8] sm:$0xff]  ;;  %s1723_s19 = smov 48   ;;  %s1724_s20 = smov 56   ;;  %vm1238_vm5 = vcmask 195584  }
  0x3c   :  { %1487 = vmatpush3.msra.mxu0 %v93_v5  ;;  %v89_v14 = vld [vmem:[#allocation2 + $0x48] sm:$0xff]  ;;  %176 = vmatprep.mubr.f32.mxu0 %v79_v13  ;;  %v87_v18 = vld [vmem:[#allocation2 + $0x38] sm:$0xff]  ;;  %v102_v19 = vld [vmem:[#allocation2 + $0xb0] sm:$0xff]  ;;  %s1725_s3 = smov 40   ;;  %s1726_s4 = smov 24   ;;  %vm1241_vm6 = vcmask 326656  }
  0x3d   :  { %1488 = vmatprep.subr.mxu0 %v108_v6  ;;  %v86_v20 = vld [vmem:[#allocation2 + $0x30] sm:$0xff]  ;;  %v101_v21 = vld [vmem:[#allocation2 + $0xa8] sm:$0xff]  ;;  %v100_v23 = vld [vmem:[#allocation2 + $0xa0] sm:$0xff]  ;;  %vm1243_vm7 = vcmask 392192   ;;  %vm1245_vm8 = vcmask 457728   ;;  %vm1248_vm9 = vcmask 588800  }
  0x3e   :  { %1489 = vmatpush3.msra.mxu0 %v92_v7  ;;  %v85_v22 = vld [vmem:[#allocation2 + $0x28] sm:$0xff]  ;;  %v84_v24 = vld [vmem:[#allocation2 + $0x20] sm:$0xff]  ;;  %v99_v25 = vld [vmem:[#allocation2 + $0x98] sm:$0xff]  ;;  %vm1250_vm10 = vcmask 654336   ;;  %vm1252_vm11 = vcmask 719872   ;;  %vm1255_vm12 = vcmask 850944  }
  0x3f   :  { %1490 = vmatprep.subr.mxu0 %v107_v8  ;;  %v83_v26 = vld [vmem:[#allocation2 + $0x18] sm:$0xff]  ;;  %v98_v27 = vld [vmem:[#allocation2 + $0x90] sm:$0xff]  ;;  %v97_v29 = vld [vmem:[#allocation2 + $0x88] sm:$0xff]  ;;  %vm1257_vm13 = vcmask 916480   ;;  %vm1259_vm14 = vcmask 982016  }
  0x40   :  { %1491 = vmatpush3.msra.mxu0 %v91_v9  ;;  %v82_v28 = vld [vmem:[#allocation2 + $0x10] sm:$0xff]  ;;  %v81_v30 = vld [vmem:[#allocation2 + $0x8] sm:$0xff]  ;;  %v96_v31 = vld [vmem:[#allocation2 + $0x80] sm:$0xff] }
  0x41   :  { %1492 = vmatprep.subr.mxu0 %v106_v10  ;;  %v80_v32 = vld [vmem:[#allocation2] sm:$0xff]  ;;  %v245_v34 = vld [vmem:[#allocation4 + $0xf8] sm:$0xff]  ;;  %v244_v35 = vld [vmem:[#allocation4 + $0xf0] sm:$0xff] }
  0x42   :  { %1493 = vmatpush3.msra.mxu0 %v90_v11  ;;  %v78_v33 = vld [vmem:[%s2115_s0] sm:$0xff]  ;;  %246 = vmatprep.subr.mxu1 %v245_v34  ;;  %v243_v36 = vld [vmem:[#allocation4 + $0xe8] sm:$0xff]  ;;  %v241_v38 = vld [vmem:[#allocation4 + $0xd8] sm:$0xff] }
  0x43   :  { %1494 = vmatprep.subr.mxu0 %v105_v12  ;;  %247 = vmatpush1.msra.mxu1 %v244_v35  ;;  %v242_v37 = vld [vmem:[#allocation4 + $0xe0] sm:$0xff]  ;;  %v240_v39 = vld [vmem:[#allocation4 + $0xd0] sm:$0xff]  ;;  %v239_v40 = vld [vmem:[#allocation4 + $0xc8] sm:$0xff] }
  0x44   :  { %1495 = vmatpush3.msra.mxu0 %v89_v14  ;;  %248 = vmatprep.subr.mxu1 %v243_v36  ;;  %v238_v41 = vld [vmem:[#allocation4 + $0xc0] sm:$0xff]  ;;  %v237_v42 = vld [vmem:[#allocation4 + $0xb8] sm:$0xff]  ;;  %v236_v43 = vld [vmem:[#allocation4 + $0xb0] sm:$0xff] }
  0x45   :  { %1496 = vmatprep.subr.mxu0 %v104_v15  ;;  %249 = vmatpush1.msra.mxu1 %v242_v37  ;;  %v235_v44 = vld [vmem:[#allocation4 + $0xa8] sm:$0xff]  ;;  %v234_v45 = vld [vmem:[#allocation4 + $0xa0] sm:$0xff]  ;;  %v233_v46 = vld [vmem:[#allocation4 + $0x98] sm:$0xff] }
  0x46   :  { %1497 = vmatpush3.msra.mxu0 %v88_v16  ;;  %250 = vmatprep.subr.mxu1 %v241_v38  ;;  %v232_v48 = vld [vmem:[#allocation4 + $0x90] sm:$0xff]  ;;  %v231_v49 = vld [vmem:[#allocation4 + $0x88] sm:$0xff]  ;;  %v230_v50 = vld [vmem:[#allocation4 + $0x80] sm:$0xff] }
  0x47   :  { %1498 = vmatprep.subr.mxu0 %v103_v17  ;;  %251 = vmatpush1.msra.mxu1 %v240_v39  ;;  %v229_v51 = vld [vmem:[#allocation4 + $0x78] sm:$0xff]  ;;  %v228_v52 = vld [vmem:[#allocation4 + $0x70] sm:$0xff]  ;;  %v227_v53 = vld [vmem:[#allocation4 + $0x68] sm:$0xff] }
  0x48   :  { %1499 = vmatpush3.msra.mxu0 %v87_v18  ;;  %252 = vmatprep.subr.mxu1 %v239_v40  ;;  %v226_v54 = vld [vmem:[#allocation4 + $0x60] sm:$0xff]  ;;  %v225_v55 = vld [vmem:[#allocation4 + $0x58] sm:$0xff]  ;;  %v224_v56 = vld [vmem:[#allocation4 + $0x50] sm:$0xff] }
  0x49   :  { %1500 = vmatprep.subr.mxu0 %v102_v19  ;;  %253 = vmatpush1.msra.mxu1 %v238_v41  ;;  %v223_v57 = vld [vmem:[#allocation4 + $0x48] sm:$0xff]  ;;  %v222_v58 = vld [vmem:[#allocation4 + $0x40] sm:$0xff]  ;;  %v221_v59 = vld [vmem:[#allocation4 + $0x38] sm:$0xff] }
  0x4a   :  { %1501 = vmatpush3.msra.mxu0 %v86_v20  ;;  %254 = vmatprep.subr.mxu1 %v237_v42  ;;  %v220_v60 = vld [vmem:[#allocation4 + $0x30] sm:$0xff]  ;;  %v219_v61 = vld [vmem:[#allocation4 + $0x28] sm:$0xff]  ;;  %v218_v62 = vld [vmem:[#allocation4 + $0x20] sm:$0xff] }
  0x4b   :  { %1502 = vmatprep.subr.mxu0 %v101_v21  ;;  %255 = vmatpush1.msra.mxu1 %v236_v43  ;;  %v217_v63 = vld [vmem:[#allocation4 + $0x18] sm:$0xff]  ;;  %v216_v0 = vld [vmem:[#allocation4 + $0x10] sm:$0xff]  ;;  %v215_v1 = vld [vmem:[#allocation4 + $0x8] sm:$0xff] }
  0x4c   :  { %1503 = vmatpush3.msra.mxu0 %v85_v22  ;;  %256 = vmatprep.subr.mxu1 %v235_v44  ;;  %v214_v2 = vld [vmem:[#allocation4] sm:$0xff] }
  0x4d   :  { %1504 = vmatprep.subr.mxu0 %v100_v23  ;;  %257 = vmatpush1.msra.mxu1 %v234_v45  ;;  %v203_v23 = vlaneseq }
  0x4e   :  { %1505 = vmatpush3.msra.mxu0 %v84_v24  ;;  %258 = vmatprep.subr.mxu1 %v233_v46 }
  0x4f   :  { %1506 = vmatprep.subr.mxu0 %v99_v25  ;;  %259 = vmatpush1.msra.mxu1 %v232_v48  ;;  %v204_v24 = vshrl.u32 %v203_v23, 7  ;;  %v200_v25 = vld [vmem:[%s2120_s5] sm:$0x1]  ;;  %v459_v23 = vld [vmem:[#allocation6 + $0x198] sm:$0xff] }
  0x50   :  { %1507 = vmatpush3.msra.mxu0 %v83_v26  ;;  %260 = vmatprep.subr.mxu1 %v231_v49 }
  0x51   :  { %1508 = vmatprep.subr.mxu0 %v98_v27  ;;  %261 = vmatpush1.msra.mxu1 %v230_v50  ;;  %v1787_v26 = vsub.s32 0, %v204_v24  ;;  %v456_v24 = vld [vmem:[#allocation6 + $0x180] sm:$0xff] }
  0x52   :  { %1509 = vmatpush3.msra.mxu0 %v82_v28  ;;  %262 = vmatprep.subr.mxu1 %v229_v51 }
  0x53   :  { %1510 = vmatprep.subr.mxu0 %v97_v29  ;;  %263 = vmatpush1.msra.mxu1 %v228_v52 }
  0x54   :  { %1511 = vmatpush3.msra.mxu0 %v81_v30  ;;  %264 = vmatprep.subr.mxu1 %v227_v53  ;;  %v1481_v30 = vld [vmem:[%s2120_s5 + $0x1] ss:$0 sm:$0xff] }
  0x55   :  { %1512 = vmatprep.subr.mxu0 %v96_v31  ;;  %265 = vmatpush1.msra.mxu1 %v226_v54 }
  0x56   :  { %1513 = vmatpush3.msra.mxu0 %v80_v32  ;;  %266 = vmatprep.subr.mxu1 %v225_v55 }
  0x57   :  { %177 = vmatmul.mubr.f32.vlgmr.msra.gmra.mxu0 %v78_v33  ;;  %267 = vmatpush1.msra.mxu1 %v224_v56 }
  0x58   :  { %268 = vmatprep.subr.mxu1 %v223_v57 }
  0x59   :  { %269 = vmatpush1.msra.mxu1 %v222_v58 }
  0x5a   :  { %270 = vmatprep.subr.mxu1 %v221_v59 }
  0x5b   :  { %271 = vmatpush1.msra.mxu1 %v220_v60 }
  0x5c   :  { %272 = vmatprep.subr.mxu1 %v219_v61 }
  0x5d   :  { %273 = vmatpush1.msra.mxu1 %v218_v62 }
  0x5e   :  { %274 = vmatprep.subr.mxu1 %v217_v63 }
  0x5f   :  { %275 = vmatpush1.msra.mxu1 %v216_v0 }
  0x60   :  { %276 = vmatprep.subr.mxu1 %v215_v1 }
  0x61   :  { %277 = vmatpush1.msra.mxu1 %v214_v2 }
 0x117   :  { %v1514_v3 = vpop.f32.mrf.mxu0 }
 0x119   :  { %v1515_v4 = vpop.f32.mrf.mxu0 }
 0x11a   :  { %v1516_v5 = vadd.f32 %v1515_v4, %v1514_v3 }
 0x11c   :  { %v182_v6 = vrot.slane %v1516_v5, 4 }
 0x11e   :  { %v183_v7 = vadd.f32 %v1516_v5, %v182_v6 }
 0x120   :  { %v184_v8 = vrot.slane %v183_v7, 2 }
 0x122   :  { %v185_v9 = vadd.f32 %v184_v8, %v183_v7 }
 0x124   :  { %v186_v10 = vrot.slane %v185_v9, 1 }
 0x126   :  { %v187_v11 = vadd.f32 %v186_v10, %v185_v9  ;;  %v1817_v9 = vld [vmem:[%s2120_s5 + $0x3] sm:$0x1]  ;;  %v469_v10 = vld [vmem:[#allocation6 + $0x1e8] sm:$0xff] }
 0x127   :  { %536 = vmatprep.subr.mxu0 %v469_v10  ;;  %v412_v10 = vld [vmem:[#allocation6 + $0x20] sm:$0xff] }
 0x128   :  { %v188_v12 = vmul.f32 0.125, %v187_v11  ;;  %v471_v11 = vld [vmem:[#allocation6 + $0x1f8] sm:$0xff] }
 0x129   :  { %607 = vmatprep.subr.mxu1 %v471_v11  ;;  %v414_v11 = vld [vmem:[#allocation6 + $0x30] sm:$0xff] }
 0x12a   :  { %v189_v13 = vsub.f32 %v1516_v5, %v188_v12  ;;  %v468_v12 = vld [vmem:[#allocation6 + $0x1e0] sm:$0xff] }
 0x12b   :  { %537 = vmatpush1.msra.mxu0 %v468_v12  ;;  %v409_v12 = vld [vmem:[#allocation6 + $0x8] sm:$0xff] }
 0x12c   :  { %v190_v14 = vmul.f32 %v189_v13, %v189_v13 }
 0x12e   :  { %v191_v15 = vrot.slane %v190_v14, 4 }
 0x130   :  { %v192_v16 = vadd.f32 %v191_v15, %v190_v14  ;;  %v465_v14 = vld [vmem:[#allocation6 + $0x1c8] sm:$0xff]  ;;  %v467_v15 = vld [vmem:[#allocation6 + $0x1d8] sm:$0xff] }
 0x131   :  { %538 = vmatprep.subr.mxu0 %v465_v14  ;;  %v408_v14 = vld [vmem:[#allocation6] sm:$0xff] }
 0x132   :  { %v193_v17 = vrot.slane %v192_v16, 2 }
 0x134   :  { %v194_v18 = vadd.f32 %v193_v17, %v192_v16  ;;  %v464_v16 = vld [vmem:[#allocation6 + $0x1c0] sm:$0xff]  ;;  %v466_v17 = vld [vmem:[#allocation6 + $0x1d0] sm:$0xff] }
 0x135   :  { %539 = vmatpush1.msra.mxu0 %v464_v16  ;;  %v533_v16 = vld [vmem:[#allocation6 + $0x3e8] sm:$0xff] }
 0x136   :  { %v195_v19 = vrot.slane %v194_v18, 1 }
 0x138   :  { %v196_v20 = vadd.f32 %v195_v19, %v194_v18  ;;  %v461_v18 = vld [vmem:[#allocation6 + $0x1a8] sm:$0xff]  ;;  %v463_v19 = vld [vmem:[#allocation6 + $0x1b8] sm:$0xff] }
 0x139   :  { %540 = vmatprep.subr.mxu0 %v461_v18  ;;  %v532_v18 = vld [vmem:[#allocation6 + $0x3e0] sm:$0xff] }
 0x13a   :  { %v197_v21 = vmul.f32 0.125, %v196_v20  ;;  %v460_v20 = vld [vmem:[#allocation6 + $0x1a0] sm:$0xff] }
 0x13b   :  { %541 = vmatpush1.msra.mxu0 %v460_v20  ;;  %v529_v20 = vld [vmem:[#allocation6 + $0x3c8] sm:$0xff] }
 0x13c   :  { %v198_v22 = vadd.f32 1e-05, %v197_v21  ;;  %v462_v21 = vld [vmem:[#allocation6 + $0x1b0] sm:$0xff] }
 0x13e   :  { %1610 = vrsqrt.f32 %v198_v22  ;;  %v457_v22 = vld [vmem:[#allocation6 + $0x188] sm:$0xff] }
 0x13f   :  { %542 = vmatprep.subr.mxu0 %v457_v22  ;;  %v528_v22 = vld [vmem:[#allocation6 + $0x3c0] sm:$0xff] }
 0x140   :  { %543 = vmatpush1.msra.mxu0 %v456_v24  ;;  %v525_v24 = vld [vmem:[#allocation6 + $0x3a8] sm:$0xff] }
 0x14b   :  { %v1611_v27 = vpop.eup %1610 }
 0x14c   :  { %v202_v28 = vmul.f32 %v1611_v27, %v200_v25  ;;  %v458_v25 = vld [vmem:[#allocation6 + $0x190] sm:$0xff]  ;;  %v453_v27 = vld [vmem:[#allocation6 + $0x168] sm:$0xff] }
 0x14d   :  { %544 = vmatprep.subr.mxu0 %v453_v27  ;;  %v524_v27 = vld [vmem:[#allocation6 + $0x3a0] sm:$0xff] }
 0x14e   :  { %v206_v29 = vrot.slane %v202_v28, %v1787_v26  ;;  %v455_v28 = vld [vmem:[#allocation6 + $0x178] sm:$0xff] }
 0x150   :  { %v207_v31 = vmul.f32 %v206_v29, %v189_v13  ;;  %v470_v13 = vld [vmem:[#allocation6 + $0x1f0] sm:$0xff]  ;;  %v452_v29 = vld [vmem:[#allocation6 + $0x160] sm:$0xff] }
 0x151   :  { %545 = vmatpush1.msra.mxu0 %v452_v29  ;;  %v521_v29 = vld [vmem:[#allocation6 + $0x388] sm:$0xff] }
 0x152   :  { %v212_v32 = vadd.f32 %v1481_v30, %v207_v31  ;;  %v454_v30 = vld [vmem:[#allocation6 + $0x170] sm:$0xff]  ;;  %v449_v31 = vld [vmem:[#allocation6 + $0x148] sm:$0xff] }
 0x153   :  { %546 = vmatprep.subr.mxu0 %v449_v31  ;;  %v520_v31 = vld [vmem:[#allocation6 + $0x380] sm:$0xff] }
 0x154   :  { %v213_v33 = vmax.f32 %v212_v32, 0.0  ;;  %v451_v32 = vld [vmem:[#allocation6 + $0x158] sm:$0xff] }
 0x156   :  { %311 = vmatmul.mubr.f32.vlgmr.msra.gmra.mxu1 %v213_v33  ;;  %v448_v33 = vld [vmem:[#allocation6 + $0x140] sm:$0xff] }
 0x157   :  { %608 = vmatpush1.msra.mxu1 %v470_v13  ;;  %547 = vmatpush1.msra.mxu0 %v448_v33  ;;  %v411_v13 = vld [vmem:[#allocation6 + $0x18] sm:$0xff]  ;;  %v517_v33 = vld [vmem:[#allocation6 + $0x368] sm:$0xff] }
 0x158   :  { %609 = vmatprep.subr.mxu1 %v467_v15  ;;  %v410_v15 = vld [vmem:[#allocation6 + $0x10] sm:$0xff] }
 0x159   :  { %610 = vmatpush1.msra.mxu1 %v466_v17  ;;  %v535_v17 = vld [vmem:[#allocation6 + $0x3f8] sm:$0xff] }
 0x15a   :  { %611 = vmatprep.subr.mxu1 %v463_v19  ;;  %v534_v19 = vld [vmem:[#allocation6 + $0x3f0] sm:$0xff] }
 0x15b   :  { %612 = vmatpush1.msra.mxu1 %v462_v21  ;;  %v531_v21 = vld [vmem:[#allocation6 + $0x3d8] sm:$0xff] }
 0x15c   :  { %613 = vmatprep.subr.mxu1 %v459_v23  ;;  %v530_v23 = vld [vmem:[#allocation6 + $0x3d0] sm:$0xff] }
 0x15d   :  { %614 = vmatpush1.msra.mxu1 %v458_v25  ;;  %v527_v25 = vld [vmem:[#allocation6 + $0x3b8] sm:$0xff] }
 0x15e   :  { %615 = vmatprep.subr.mxu1 %v455_v28  ;;  %v526_v28 = vld [vmem:[#allocation6 + $0x3b0] sm:$0xff] }
 0x15f   :  { %616 = vmatpush1.msra.mxu1 %v454_v30  ;;  %v523_v30 = vld [vmem:[#allocation6 + $0x398] sm:$0xff] }
 0x160   :  { %617 = vmatprep.subr.mxu1 %v451_v32  ;;  %v522_v32 = vld [vmem:[#allocation6 + $0x390] sm:$0xff] }
 0x216   :  { %v312_v34 = vpop.f32.mrf.mxu1 }
 0x217   :  { %v317_v35 = vrot.slane %v312_v34, 4 }
 0x218   :  { %v314_v36 = vpop.f32.mrf.mxu1 }
 0x219   :  { %v318_v37 = vadd.f32 %v317_v35, %v312_v34  ;;  %v323_v38 = vrot.slane %v314_v36, 4  ;;  %v445_v35 = vld [vmem:[#allocation6 + $0x128] sm:$0xff] }
 0x21a   :  { %548 = vmatprep.subr.mxu0 %v445_v35  ;;  %v516_v35 = vld [vmem:[#allocation6 + $0x360] sm:$0xff] }
 0x21b   :  { %v324_v39 = vadd.f32 %v323_v38, %v314_v36  ;;  %v319_v40 = vrot.slane %v318_v37, 2  ;;  %v446_v38 = vld [vmem:[#allocation6 + $0x130] sm:$0xff] }
 0x21d   :  { %v325_v41 = vrot.slane %v324_v39, 2  ;;  %v320_v42 = vadd.f32 %v319_v40, %v318_v37  ;;  %v444_v37 = vld [vmem:[#allocation6 + $0x120] sm:$0xff]  ;;  %v443_v40 = vld [vmem:[#allocation6 + $0x118] sm:$0xff] }
 0x21e   :  { %549 = vmatpush1.msra.mxu0 %v444_v37  ;;  %v513_v37 = vld [vmem:[#allocation6 + $0x348] sm:$0xff] }
 0x21f   :  { %v326_v43 = vadd.f32 %v325_v41, %v324_v39  ;;  %v321_v44 = vrot.slane %v320_v42, 1  ;;  %v441_v39 = vld [vmem:[#allocation6 + $0x108] sm:$0xff]  ;;  %v440_v41 = vld [vmem:[#allocation6 + $0x100] sm:$0xff] }
 0x220   :  { %550 = vmatprep.subr.mxu0 %v441_v39  ;;  %v512_v39 = vld [vmem:[#allocation6 + $0x340] sm:$0xff] }
 0x221   :  { %v322_v45 = vadd.f32 %v321_v44, %v320_v42  ;;  %v327_v46 = vrot.slane %v326_v43, 1  ;;  %v442_v42 = vld [vmem:[#allocation6 + $0x110] sm:$0xff]  ;;  %v439_v44 = vld [vmem:[#allocation6 + $0xf8] sm:$0xff]  ;;  %551 = vmatpush1.msra.mxu0 %v440_v41  ;;  %v509_v41 = vld [vmem:[#allocation6 + $0x328] sm:$0xff] }
 0x223   :  { %330 = vrot.lane.b32.xlu0 %v322_v45, %s1715_s27  ;;  %v328_v47 = vadd.f32 %v327_v46, %v326_v43  ;;  %v437_v43 = vld [vmem:[#allocation6 + $0xe8] sm:$0xff]  ;;  %v438_v46 = vld [vmem:[#allocation6 + $0xf0] sm:$0xff] }
 0x224   :  { %552 = vmatprep.subr.mxu0 %v437_v43  ;;  %v508_v43 = vld [vmem:[#allocation6 + $0x320] sm:$0xff] }
 0x227   :  { %336 = vrot.lane.b32.xlu0 %v328_v47, %s1715_s27 }
 0x295   :  { %v331_v48 = vpop.permute.xlu0 %330 }
 0x296   :  { %v333_v49 = vadd.f32 %v331_v48, %v322_v45  ;;  %v436_v45 = vld [vmem:[#allocation6 + $0xe0] sm:$0xff]  ;;  %v435_v48 = vld [vmem:[#allocation6 + $0xd8] sm:$0xff] }
 0x297   :  { %553 = vmatpush1.msra.mxu0 %v436_v45  ;;  %v505_v45 = vld [vmem:[#allocation6 + $0x308] sm:$0xff] }
 0x298   :  { %v334_v50 = vadd.f32 %v333_v49, %v328_v47  ;;  %v433_v47 = vld [vmem:[#allocation6 + $0xc8] sm:$0xff]  ;;  %v432_v49 = vld [vmem:[#allocation6 + $0xc0] sm:$0xff] }
 0x299   :  { %v337_v51 = vpop.permute.xlu0 %336  ;;  %554 = vmatprep.subr.mxu0 %v433_v47  ;;  %v504_v47 = vld [vmem:[#allocation6 + $0x300] sm:$0xff] }
 0x29a   :  { %v339_v52 = vadd.f32 %v337_v51, %v334_v50  ;;  %v434_v50 = vld [vmem:[#allocation6 + $0xd0] sm:$0xff]  ;;  %v429_v51 = vld [vmem:[#allocation6 + $0xa8] sm:$0xff]  ;;  %555 = vmatpush1.msra.mxu0 %v432_v49 }
 0x29b   :  { %556 = vmatprep.subr.mxu0 %v429_v51  ;;  %v501_v49 = vld [vmem:[#allocation6 + $0x2e8] sm:$0xff]  ;;  %v500_v51 = vld [vmem:[#allocation6 + $0x2e0] sm:$0xff] }
 0x29c   :  { %v340_v53 = vmul.f32 0.03125, %v339_v52  ;;  %v431_v52 = vld [vmem:[#allocation6 + $0xb8] sm:$0xff] }
 0x29e   :  { %342 = vrot.lane.b32.xlu1 %v340_v53, %s1715_s27 }
 0x310   :  { %v343_v54 = vpop.permute.xlu1 %342 }
 0x311   :  { %v346_v55 = vsel %vm345_vm0, %v340_v53, %v343_v54  ;;  %v428_v53 = vld [vmem:[#allocation6 + $0xa0] sm:$0xff]  ;;  %v430_v54 = vld [vmem:[#allocation6 + $0xb0] sm:$0xff] }
 0x312   :  { %v350_v56 = vrot.slane %v346_v55, %v1787_v26  ;;  %v425_v55 = vld [vmem:[#allocation6 + $0x88] sm:$0xff]  ;;  %557 = vmatpush1.msra.mxu0 %v428_v53 }
 0x313   :  { %558 = vmatprep.subr.mxu0 %v425_v55  ;;  %v497_v53 = vld [vmem:[#allocation6 + $0x2c8] sm:$0xff]  ;;  %v496_v55 = vld [vmem:[#allocation6 + $0x2c0] sm:$0xff] }
 0x314   :  { %v1798_v57 = vsub.f32 %v312_v34, %v350_v56  ;;  %v1800_v58 = vsub.f32 %v314_v36, %v350_v56  ;;  %v450_v34 = vld [vmem:[#allocation6 + $0x150] sm:$0xff]  ;;  %v447_v36 = vld [vmem:[#allocation6 + $0x138] sm:$0xff] }
 0x315   :  { %618 = vmatpush1.msra.mxu1 %v450_v34  ;;  %v427_v56 = vld [vmem:[#allocation6 + $0x98] sm:$0xff] }
 0x316   :  { %v353_v59 = vmul.f32 %v1798_v57, %v1798_v57  ;;  %v354_v60 = vmul.f32 %v1800_v58, %v1800_v58  ;;  %619 = vmatprep.subr.mxu1 %v447_v36  ;;  %v519_v34 = vld [vmem:[#allocation6 + $0x378] sm:$0xff]  ;;  %v518_v36 = vld [vmem:[#allocation6 + $0x370] sm:$0xff] }
 0x317   :  { %620 = vmatpush1.msra.mxu1 %v446_v38  ;;  %v515_v38 = vld [vmem:[#allocation6 + $0x358] sm:$0xff] }
 0x318   :  { %v355_v61 = vrot.slane %v353_v59, 4  ;;  %v361_v62 = vrot.slane %v354_v60, 4  ;;  %621 = vmatprep.subr.mxu1 %v443_v40  ;;  %v514_v40 = vld [vmem:[#allocation6 + $0x350] sm:$0xff] }
 0x319   :  { %622 = vmatpush1.msra.mxu1 %v442_v42  ;;  %v511_v42 = vld [vmem:[#allocation6 + $0x338] sm:$0xff] }
 0x31a   :  { %v362_v63 = vadd.f32 %v361_v62, %v354_v60  ;;  %v356_v0 = vadd.f32 %v355_v61, %v353_v59  ;;  %623 = vmatprep.subr.mxu1 %v439_v44  ;;  %v424_v59 = vld [vmem:[#allocation6 + $0x80] sm:$0xff]  ;;  %v426_v60 = vld [vmem:[#allocation6 + $0x90] sm:$0xff]  ;;  %v421_v61 = vld [vmem:[#allocation6 + $0x68] sm:$0xff] }
 0x31b   :  { %624 = vmatpush1.msra.mxu1 %v438_v46  ;;  %v423_v62 = vld [vmem:[#allocation6 + $0x78] sm:$0xff]  ;;  %559 = vmatpush1.msra.mxu0 %v424_v59  ;;  %v510_v44 = vld [vmem:[#allocation6 + $0x330] sm:$0xff]  ;;  %v493_v59 = vld [vmem:[#allocation6 + $0x2a8] sm:$0xff] }
 0x31c   :  { %v363_v1 = vrot.slane %v362_v63, 2  ;;  %v357_v2 = vrot.slane %v356_v0, 2  ;;  %625 = vmatprep.subr.mxu1 %v435_v48  ;;  %560 = vmatprep.subr.mxu0 %v421_v61  ;;  %v507_v46 = vld [vmem:[#allocation6 + $0x318] sm:$0xff]  ;;  %v506_v48 = vld [vmem:[#allocation6 + $0x310] sm:$0xff]  ;;  %v492_v61 = vld [vmem:[#allocation6 + $0x2a0] sm:$0xff] }
 0x31d   :  { %626 = vmatpush1.msra.mxu1 %v434_v50  ;;  %v503_v50 = vld [vmem:[#allocation6 + $0x2f8] sm:$0xff] }
 0x31e   :  { %v364_v3 = vadd.f32 %v363_v1, %v362_v63  ;;  %v358_v4 = vadd.f32 %v357_v2, %v356_v0  ;;  %627 = vmatprep.subr.mxu1 %v431_v52  ;;  %v420_v63 = vld [vmem:[#allocation6 + $0x60] sm:$0xff]  ;;  %v422_v0 = vld [vmem:[#allocation6 + $0x70] sm:$0xff]  ;;  %v417_v1 = vld [vmem:[#allocation6 + $0x48] sm:$0xff] }
 0x31f   :  { %628 = vmatpush1.msra.mxu1 %v430_v54  ;;  %v419_v2 = vld [vmem:[#allocation6 + $0x58] sm:$0xff]  ;;  %561 = vmatpush1.msra.mxu0 %v420_v63  ;;  %v502_v52 = vld [vmem:[#allocation6 + $0x2f0] sm:$0xff] }
 0x320   :  { %v365_v5 = vrot.slane %v364_v3, 1  ;;  %v359_v6 = vrot.slane %v358_v4, 1  ;;  %629 = vmatprep.subr.mxu1 %v427_v56  ;;  %562 = vmatprep.subr.mxu0 %v417_v1  ;;  %v499_v54 = vld [vmem:[#allocation6 + $0x2d8] sm:$0xff]  ;;  %v498_v56 = vld [vmem:[#allocation6 + $0x2d0] sm:$0xff] }
 0x321   :  { %630 = vmatpush1.msra.mxu1 %v426_v60  ;;  %v495_v60 = vld [vmem:[#allocation6 + $0x2b8] sm:$0xff] }
 0x322   :  { %v1806_v7 = vadd.f32 %v365_v5, %v364_v3  ;;  %v1808_v8 = vadd.f32 %v359_v6, %v358_v4  ;;  %v416_v3 = vld [vmem:[#allocation6 + $0x40] sm:$0xff]  ;;  %631 = vmatprep.subr.mxu1 %v423_v62  ;;  %v418_v4 = vld [vmem:[#allocation6 + $0x50] sm:$0xff]  ;;  %v413_v5 = vld [vmem:[#allocation6 + $0x28] sm:$0xff] }
 0x323   :  { %632 = vmatpush1.msra.mxu1 %v422_v0  ;;  %v415_v6 = vld [vmem:[#allocation6 + $0x38] sm:$0xff]  ;;  %563 = vmatpush1.msra.mxu0 %v416_v3  ;;  %v494_v62 = vld [vmem:[#allocation6 + $0x2b0] sm:$0xff] }
 0x324   :  { %374 = vrot.lane.b32.xlu0 %v1806_v7, %s1715_s27  ;;  %368 = vrot.lane.b32.xlu1 %v1808_v8, %s1715_s27 }
 0x325   :  { %633 = vmatprep.subr.mxu1 %v419_v2  ;;  %564 = vmatprep.subr.mxu0 %v413_v5 }
 0x326   :  { %634 = vmatpush1.msra.mxu1 %v418_v4  ;;  %565 = vmatpush1.msra.mxu0 %v412_v10  ;;  %v491_v10 = vld [vmem:[#allocation6 + $0x298] sm:$0xff] }
 0x327   :  { %635 = vmatprep.subr.mxu1 %v415_v6  ;;  %566 = vmatprep.subr.mxu0 %v409_v12  ;;  %v489_v6 = vld [vmem:[#allocation6 + $0x288] sm:$0xff]  ;;  %v490_v12 = vld [vmem:[#allocation6 + $0x290] sm:$0xff] }
 0x328   :  { %390 = vrot.lane.b32.xlu0 %v1817_v9, %s1715_s27  ;;  %636 = vmatpush1.msra.mxu1 %v414_v11  ;;  %v488_v11 = vld [vmem:[#allocation6 + $0x280] sm:$0xff] }
 0x329   :  { %637 = vmatprep.subr.mxu1 %v411_v13  ;;  %567 = vmatpush1.msra.mxu0 %v408_v14  ;;  %v485_v13 = vld [vmem:[#allocation6 + $0x268] sm:$0xff]  ;;  %v487_v14 = vld [vmem:[#allocation6 + $0x278] sm:$0xff] }
 0x32a   :  { %638 = vmatpush1.msra.mxu1 %v410_v15  ;;  %568 = vmatprep.subr.mxu0 %v533_v16  ;;  %v486_v15 = vld [vmem:[#allocation6 + $0x270] sm:$0xff]  ;;  %v483_v16 = vld [vmem:[#allocation6 + $0x258] sm:$0xff] }
 0x32b   :  { %639 = vmatprep.subr.mxu1 %v535_v17  ;;  %569 = vmatpush2.msra.mxu0 %v532_v18  ;;  %v480_v17 = vld [vmem:[#allocation6 + $0x240] sm:$0xff]  ;;  %v482_v18 = vld [vmem:[#allocation6 + $0x250] sm:$0xff] }
 0x32c   :  { %640 = vmatpush2.msra.mxu1 %v534_v19  ;;  %570 = vmatprep.subr.mxu0 %v529_v20  ;;  %v477_v19 = vld [vmem:[#allocation6 + $0x228] sm:$0xff]  ;;  %v479_v20 = vld [vmem:[#allocation6 + $0x238] sm:$0xff] }
 0x32d   :  { %641 = vmatprep.subr.mxu1 %v531_v21  ;;  %571 = vmatpush2.msra.mxu0 %v528_v22  ;;  %v476_v21 = vld [vmem:[#allocation6 + $0x220] sm:$0xff]  ;;  %v478_v22 = vld [vmem:[#allocation6 + $0x230] sm:$0xff] }
 0x32e   :  { %642 = vmatpush2.msra.mxu1 %v530_v23  ;;  %572 = vmatprep.subr.mxu0 %v525_v24  ;;  %v473_v23 = vld [vmem:[#allocation6 + $0x208] sm:$0xff]  ;;  %v475_v24 = vld [vmem:[#allocation6 + $0x218] sm:$0xff] }
 0x32f   :  { %643 = vmatprep.subr.mxu1 %v527_v25  ;;  %573 = vmatpush2.msra.mxu0 %v524_v27  ;;  %v472_v25 = vld [vmem:[#allocation6 + $0x200] sm:$0xff] }
 0x330   :  { %644 = vmatpush2.msra.mxu1 %v526_v28  ;;  %574 = vmatprep.subr.mxu0 %v521_v29  ;;  %v381_v27 = vld [vmem:[%s2120_s5 + $0x2] sm:$0x1]  ;;  %v474_v28 = vld [vmem:[#allocation6 + $0x210] sm:$0xff] }
 0x331   :  { %645 = vmatprep.subr.mxu1 %v523_v30  ;;  %575 = vmatpush2.msra.mxu0 %v520_v31 }
 0x332   :  { %646 = vmatpush2.msra.mxu1 %v522_v32  ;;  %576 = vmatprep.subr.mxu0 %v517_v33 }
 0x333   :  { %647 = vmatprep.subr.mxu1 %v519_v34  ;;  %577 = vmatpush2.msra.mxu0 %v516_v35 }
 0x334   :  { %648 = vmatpush2.msra.mxu1 %v518_v36  ;;  %578 = vmatprep.subr.mxu0 %v513_v37 }
 0x335   :  { %649 = vmatprep.subr.mxu1 %v515_v38  ;;  %579 = vmatpush2.msra.mxu0 %v512_v39 }
 0x336   :  { %650 = vmatpush2.msra.mxu1 %v514_v40  ;;  %580 = vmatprep.subr.mxu0 %v509_v41 }
 0x337   :  { %651 = vmatprep.subr.mxu1 %v511_v42  ;;  %581 = vmatpush2.msra.mxu0 %v508_v43 }
 0x338   :  { %652 = vmatpush2.msra.mxu1 %v510_v44  ;;  %582 = vmatprep.subr.mxu0 %v505_v45 }
 0x339   :  { %653 = vmatprep.subr.mxu1 %v507_v46  ;;  %583 = vmatpush2.msra.mxu0 %v504_v47 }
 0x33a   :  { %654 = vmatpush2.msra.mxu1 %v506_v48  ;;  %584 = vmatprep.subr.mxu0 %v501_v49 }
 0x33b   :  { %655 = vmatprep.subr.mxu1 %v503_v50  ;;  %585 = vmatpush2.msra.mxu0 %v500_v51 }
 0x33c   :  { %656 = vmatpush2.msra.mxu1 %v502_v52  ;;  %586 = vmatprep.subr.mxu0 %v497_v53 }
 0x33d   :  { %657 = vmatprep.subr.mxu1 %v499_v54  ;;  %587 = vmatpush2.msra.mxu0 %v496_v55 }
 0x33e   :  { %658 = vmatpush2.msra.mxu1 %v498_v56  ;;  %588 = vmatprep.subr.mxu0 %v493_v59 }
 0x33f   :  { %659 = vmatprep.subr.mxu1 %v495_v60  ;;  %589 = vmatpush2.msra.mxu0 %v492_v61 }
 0x340   :  { %660 = vmatpush2.msra.mxu1 %v494_v62  ;;  %590 = vmatprep.subr.mxu0 %v489_v6 }
 0x341   :  { %661 = vmatprep.subr.mxu1 %v491_v10  ;;  %591 = vmatpush2.msra.mxu0 %v488_v11 }
 0x342   :  { %662 = vmatpush2.msra.mxu1 %v490_v12  ;;  %592 = vmatprep.subr.mxu0 %v485_v13 }
 0x343   :  { %663 = vmatprep.subr.mxu1 %v487_v14 }
 0x344   :  { %664 = vmatpush2.msra.mxu1 %v486_v15 }
 0x345   :  { %665 = vmatprep.subr.mxu1 %v483_v16 }
 0x346   :  { %666 = vmatpush2.msra.mxu1 %v482_v18 }
 0x347   :  { %667 = vmatprep.subr.mxu1 %v479_v20 }
 0x348   :  { %668 = vmatpush2.msra.mxu1 %v478_v22 }
 0x349   :  { %669 = vmatprep.subr.mxu1 %v475_v24 }
 0x34a   :  { %670 = vmatpush2.msra.mxu1 %v474_v28 }
 0x396   :  { %v369_v63 = vpop.permute.xlu1 %368  ;;  %v375_v2 = vpop.permute.xlu0 %374 }
 0x397   :  { %v371_v0 = vadd.f32 %v369_v63, %v1808_v8  ;;  %v484_v8 = vld [vmem:[#allocation6 + $0x260] sm:$0xff] }
 0x398   :  { %593 = vmatpush2.msra.mxu0 %v484_v8 }
 0x399   :  { %v372_v1 = vadd.f32 %v371_v0, %v1806_v7  ;;  %v481_v7 = vld [vmem:[#allocation6 + $0x248] sm:$0xff] }
 0x39a   :  { %594 = vmatprep.subr.mxu0 %v481_v7  ;;  %v391_v31 = vpop.permute.xlu0 %390 }
 0x39b   :  { %v377_v3 = vadd.f32 %v375_v2, %v372_v1  ;;  %595 = vmatpush2.msra.mxu0 %v480_v17  ;;  %v393_v32 = vsel %vm345_vm0, %v1817_v9, %v391_v31 }
 0x39c   :  { %596 = vmatprep.subr.mxu0 %v477_v19  ;;  %v403_v36 = vrot.slane %v393_v32, %v1787_v26 }
 0x39d   :  { %v378_v4 = vmul.f32 0.03125, %v377_v3  ;;  %597 = vmatpush2.msra.mxu0 %v476_v21 }
 0x39e   :  { %598 = vmatprep.subr.mxu0 %v473_v23 }
 0x39f   :  { %v379_v5 = vadd.f32 1e-05, %v378_v4  ;;  %599 = vmatpush2.msra.mxu0 %v472_v25 }
 0x3a1   :  { %1612 = vrsqrt.f32 %v379_v5 }
 0x3ae   :  { %v1613_v29 = vpop.eup %1612 }
 0x3af   :  { %v383_v30 = vmul.f32 %v1613_v29, %v381_v27 }
 0x3b1   :  { %385 = vrot.lane.b32.xlu1 %v383_v30, %s1715_s27 }
 0x423   :  { %v386_v33 = vpop.permute.xlu1 %385 }
 0x424   :  { %v388_v34 = vsel %vm345_vm0, %v383_v30, %v386_v33 }
 0x425   :  { %v397_v35 = vrot.slane %v388_v34, %v1787_v26 }
 0x427   :  { %v398_v37 = vmul.f32 %v397_v35, %v1798_v57  ;;  %v399_v38 = vmul.f32 %v397_v35, %v1800_v58 }
 0x429   :  { %v404_v39 = vadd.f32 %v403_v36, %v398_v37  ;;  %v405_v40 = vadd.f32 %v403_v36, %v399_v38 }
 0x42b   :  { %v406_v41 = vmax.f32 %v404_v39, 0.0  ;;  %v407_v42 = vmax.f32 %v405_v40, 0.0 }
 0x42d   :  { %600 = vmatprep.mubr.f32.mxu0 %v407_v42  ;;  %671 = vmatprep.mubr.f32.mxu1 %v407_v42 }
 0x42e   :  { %601 = vmatmul.mubr.f32.vlgmr.msra.gmra.mxu0 %v406_v41  ;;  %672 = vmatmul.mubr.f32.vlgmr.msra.gmra.mxu1 %v406_v41 }
 0x4ee   :  { %v1834_v9 = vpop.f32.mrf.mxu0  ;;  %v1836_v43 = vpop.f32.mrf.mxu1 }
 0x4ef   :  { %v678_v44 = vrot.slane %v1834_v9, 4  ;;  %v690_v58 = vrot.slane %v1836_v43, 4 }
 0x4f0   :  { %v1839_v45 = vpop.f32.mrf.mxu0  ;;  %v1844_v47 = vpop.f32.mrf.mxu1 }
 0x4f1   :  { %v679_v57 = vadd.f32 %v678_v44, %v1834_v9  ;;  %v684_v46 = vrot.slane %v1839_v45, 4  ;;  %v691_v51 = vadd.f32 %v690_v58, %v1836_v43  ;;  %v696_v53 = vrot.slane %v1844_v47, 4 }
 0x4f3   :  { %v680_v48 = vrot.slane %v679_v57, 2  ;;  %v685_v49 = vadd.f32 %v684_v46, %v1839_v45  ;;  %v692_v56 = vrot.slane %v691_v51, 2  ;;  %v697_v60 = vadd.f32 %v696_v53, %v1844_v47 }
 0x4f5   :  { %v681_v50 = vadd.f32 %v680_v48, %v679_v57  ;;  %v686_v52 = vrot.slane %v685_v49, 2  ;;  %v693_v62 = vadd.f32 %v692_v56, %v691_v51  ;;  %v698_v63 = vrot.slane %v697_v60, 2 }
 0x4f7   :  { %v682_v54 = vrot.slane %v681_v50, 1  ;;  %v687_v55 = vadd.f32 %v686_v52, %v685_v49  ;;  %v694_v1 = vrot.slane %v693_v62, 1  ;;  %v699_v2 = vadd.f32 %v698_v63, %v697_v60 }
 0x4f9   :  { %v688_v59 = vrot.slane %v687_v55, 1  ;;  %v683_v61 = vadd.f32 %v682_v54, %v681_v50  ;;  %v700_v3 = vrot.slane %v699_v2, 1  ;;  %v695_v4 = vadd.f32 %v694_v1, %v693_v62 }
 0x4fb   :  { %707 = vrot.lane.b32.xlu0 %v683_v61, %s1715_s27  ;;  %703 = vrot.lane.b32.xlu1 %v683_v61, %s1716_s9  ;;  %v689_v0 = vadd.f32 %v688_v59, %v687_v55  ;;  %v701_v5 = vadd.f32 %v700_v3, %v699_v2 }
 0x4ff   :  { %711 = vrot.lane.b32.xlu1 %v683_v61, %s1712_s14  ;;  %717 = vrot.lane.b32.xlu0 %v689_v0, %s1716_s9 }
 0x503   :  { %721 = vrot.lane.b32.xlu1 %v689_v0, %s1715_s27  ;;  %725 = vrot.lane.b32.xlu0 %v689_v0, %s1712_s14 }
 0x507   :  { %731 = vrot.lane.b32.xlu1 %v695_v4, %s1716_s9  ;;  %735 = vrot.lane.b32.xlu0 %v695_v4, %s1715_s27 }
 0x50b   :  { %739 = vrot.lane.b32.xlu1 %v695_v4, %s1712_s14  ;;  %745 = vrot.lane.b32.xlu0 %v701_v5, %s1716_s9 }
 0x50f   :  { %749 = vrot.lane.b32.xlu1 %v701_v5, %s1715_s27  ;;  %753 = vrot.lane.b32.xlu0 %v701_v5, %s1712_s14 }
 0x56d   :  { %v708_v6 = vpop.permute.xlu0 %707  ;;  %v704_v10 = vpop.permute.xlu1 %703 }
 0x56e   :  { %v706_v11 = vadd.f32 %v704_v10, %v683_v61 }
 0x570   :  { %v710_v12 = vadd.f32 %v708_v6, %v706_v11 }
 0x571   :  { %v712_v13 = vpop.permute.xlu1 %711  ;;  %v718_v14 = vpop.permute.xlu0 %717 }
 0x572   :  { %v714_v8 = vadd.f32 %v712_v13, %v710_v12  ;;  %v1924_v13 = vld [vmem:[%s2120_s5 + $0x5] sm:$0x1] }
 0x574   :  { %v715_v15 = vadd.f32 %v714_v8, %v689_v0  ;;  %v979_v8 = vld [vmem:[#allocation7 + $0x1f8] sm:$0xff] }
 0x575   :  { %v722_v7 = vpop.permute.xlu1 %721  ;;  %v726_v17 = vpop.permute.xlu0 %725  ;;  %1552 = vmatprep.subr.mxu1 %v979_v8 }
 0x576   :  { %v720_v16 = vadd.f32 %v718_v14, %v715_v15  ;;  %v947_v14 = vld [vmem:[#allocation7 + $0xf8] sm:$0xff] }
 0x577   :  { %v931_v15 = vld [vmem:[#allocation7 + $0x78] sm:$0xff]  ;;  %1517 = vmatprep.subr.mxu0 %v947_v14 }
 0x578   :  { %v724_v18 = vadd.f32 %v722_v7, %v720_v16  ;;  %v963_v7 = vld [vmem:[#allocation7 + $0x178] sm:$0xff]  ;;  %v946_v16 = vld [vmem:[#allocation7 + $0xf0] sm:$0xff]  ;;  %1518 = vmatpush3.msra.mxu0 %v931_v15 }
 0x579   :  { %v732_v20 = vpop.permute.xlu1 %731  ;;  %v736_v22 = vpop.permute.xlu0 %735  ;;  %1553 = vmatpush3.msra.mxu1 %v963_v7  ;;  %1519 = vmatprep.subr.mxu0 %v946_v16  ;;  %v924_v7 = vld [vmem:[#allocation7 + $0x40] sm:$0xff] }
 0x57a   :  { %v728_v19 = vadd.f32 %v726_v17, %v724_v18  ;;  %v978_v17 = vld [vmem:[#allocation7 + $0x1f0] sm:$0xff]  ;;  %v956_v16 = vld [vmem:[#allocation7 + $0x140] sm:$0xff] }
 0x57b   :  { %v930_v18 = vld [vmem:[#allocation7 + $0x70] sm:$0xff]  ;;  %1554 = vmatprep.subr.mxu1 %v978_v17  ;;  %v971_v17 = vld [vmem:[#allocation7 + $0x1b8] sm:$0xff] }
 0x57c   :  { %v729_v21 = vadd.f32 %v728_v19, %v695_v4  ;;  %v962_v19 = vld [vmem:[#allocation7 + $0x170] sm:$0xff]  ;;  %1520 = vmatpush3.msra.mxu0 %v930_v18  ;;  %v923_v18 = vld [vmem:[#allocation7 + $0x38] sm:$0xff] }
 0x57d   :  { %v740_v25 = vpop.permute.xlu1 %739  ;;  %v746_v28 = vpop.permute.xlu0 %745  ;;  %1555 = vmatpush3.msra.mxu1 %v962_v19  ;;  %v955_v19 = vld [vmem:[#allocation7 + $0x138] sm:$0xff] }
 0x57e   :  { %v734_v23 = vadd.f32 %v732_v20, %v729_v21  ;;  %v945_v20 = vld [vmem:[#allocation7 + $0xe8] sm:$0xff] }
 0x57f   :  { %v977_v21 = vld [vmem:[#allocation7 + $0x1e8] sm:$0xff]  ;;  %1521 = vmatprep.subr.mxu0 %v945_v20  ;;  %v938_v20 = vld [vmem:[#allocation7 + $0xb0] sm:$0xff] }
 0x580   :  { %v738_v24 = vadd.f32 %v736_v22, %v734_v23  ;;  %v929_v22 = vld [vmem:[#allocation7 + $0x68] sm:$0xff]  ;;  %1556 = vmatprep.subr.mxu1 %v977_v21  ;;  %v922_v21 = vld [vmem:[#allocation7 + $0x30] sm:$0xff] }
 0x581   :  { %v750_v31 = vpop.permute.xlu1 %749  ;;  %v754_v33 = vpop.permute.xlu0 %753  ;;  %v961_v23 = vld [vmem:[#allocation7 + $0x168] sm:$0xff]  ;;  %1522 = vmatpush3.msra.mxu0 %v929_v22  ;;  %v954_v22 = vld [vmem:[#allocation7 + $0x130] sm:$0xff] }
 0x582   :  { %v742_v27 = vadd.f32 %v740_v25, %v738_v24  ;;  %v944_v24 = vld [vmem:[#allocation7 + $0xe0] sm:$0xff]  ;;  %1557 = vmatpush3.msra.mxu1 %v961_v23  ;;  %v937_v23 = vld [vmem:[#allocation7 + $0xa8] sm:$0xff] }
 0x583   :  { %v976_v25 = vld [vmem:[#allocation7 + $0x1e0] sm:$0xff]  ;;  %1523 = vmatprep.subr.mxu0 %v944_v24  ;;  %v969_v24 = vld [vmem:[#allocation7 + $0x1a8] sm:$0xff] }
 0x584   :  { %v743_v29 = vadd.f32 %v742_v27, %v701_v5  ;;  %v928_v27 = vld [vmem:[#allocation7 + $0x60] sm:$0xff]  ;;  %1558 = vmatprep.subr.mxu1 %v976_v25  ;;  %v921_v25 = vld [vmem:[#allocation7 + $0x28] sm:$0xff] }
 0x585   :  { %1524 = vmatpush3.msra.mxu0 %v928_v27  ;;  %v953_v27 = vld [vmem:[#allocation7 + $0x128] sm:$0xff] }
 0x586   :  { %v748_v30 = vadd.f32 %v746_v28, %v743_v29  ;;  %v960_v28 = vld [vmem:[#allocation7 + $0x160] sm:$0xff]  ;;  %v943_v29 = vld [vmem:[#allocation7 + $0xd8] sm:$0xff] }
 0x587   :  { %1559 = vmatpush3.msra.mxu1 %v960_v28  ;;  %1525 = vmatprep.subr.mxu0 %v943_v29  ;;  %v936_v28 = vld [vmem:[#allocation7 + $0xa0] sm:$0xff] }
 0x588   :  { %v752_v32 = vadd.f32 %v750_v31, %v748_v30  ;;  %v975_v30 = vld [vmem:[#allocation7 + $0x1d8] sm:$0xff]  ;;  %v968_v29 = vld [vmem:[#allocation7 + $0x1a0] sm:$0xff] }
 0x589   :  { %v927_v31 = vld [vmem:[#allocation7 + $0x58] sm:$0xff]  ;;  %1560 = vmatprep.subr.mxu1 %v975_v30  ;;  %v920_v30 = vld [vmem:[#allocation7 + $0x20] sm:$0xff] }
 0x58a   :  { %v756_v34 = vadd.f32 %v754_v33, %v752_v32  ;;  %v959_v32 = vld [vmem:[#allocation7 + $0x158] sm:$0xff]  ;;  %v942_v33 = vld [vmem:[#allocation7 + $0xd0] sm:$0xff]  ;;  %1526 = vmatpush3.msra.mxu0 %v927_v31  ;;  %v952_v31 = vld [vmem:[#allocation7 + $0x120] sm:$0xff] }
 0x58b   :  { %1561 = vmatpush3.msra.mxu1 %v959_v32  ;;  %1527 = vmatprep.subr.mxu0 %v942_v33  ;;  %v867_v32 = vld [vmem:[%s2120_s5 + $0x4] sm:$0x1]  ;;  %v935_v33 = vld [vmem:[#allocation7 + $0x98] sm:$0xff] }
 0x58c   :  { %v757_v35 = vmul.f32 0.0078125, %v756_v34  ;;  %v974_v34 = vld [vmem:[#allocation7 + $0x1d0] sm:$0xff] }
 0x58d   :  { %1562 = vmatprep.subr.mxu1 %v974_v34  ;;  %v967_v34 = vld [vmem:[#allocation7 + $0x198] sm:$0xff] }
 0x58e   :  { %762 = vrot.lane.b32.xlu0 %v757_v35, %s1715_s27  ;;  %759 = vrot.lane.b32.xlu1 %v757_v35, %s1712_s14 }
 0x592   :  { %765 = vrot.lane.b32.xlu1 %v757_v35, %s1716_s9 }
 0x600   :  { %v760_v36 = vpop.permute.xlu1 %759  ;;  %v763_v37 = vpop.permute.xlu0 %762 }
 0x601   :  { %v769_v38 = vsel %vm768_vm1, %v757_v35, %v760_v36  ;;  %v926_v35 = vld [vmem:[#allocation7 + $0x50] sm:$0xff] }
 0x602   :  { %v770_v39 = vsel %vm345_vm0, %v769_v38, %v763_v37  ;;  %v958_v36 = vld [vmem:[#allocation7 + $0x150] sm:$0xff]  ;;  %v941_v37 = vld [vmem:[#allocation7 + $0xc8] sm:$0xff]  ;;  %1528 = vmatpush3.msra.mxu0 %v926_v35  ;;  %v919_v35 = vld [vmem:[#allocation7 + $0x18] sm:$0xff] }
 0x603   :  { %v973_v38 = vld [vmem:[#allocation7 + $0x1c8] sm:$0xff]  ;;  %1563 = vmatpush3.msra.mxu1 %v958_v36  ;;  %1529 = vmatprep.subr.mxu0 %v941_v37  ;;  %v951_v36 = vld [vmem:[#allocation7 + $0x118] sm:$0xff] }
 0x604   :  { %v766_v40 = vpop.permute.xlu1 %765  ;;  %1564 = vmatprep.subr.mxu1 %v973_v38  ;;  %v934_v38 = vld [vmem:[#allocation7 + $0x90] sm:$0xff] }
 0x605   :  { %v772_v41 = vsel %vm771_vm2, %v770_v39, %v766_v40  ;;  %v925_v39 = vld [vmem:[#allocation7 + $0x48] sm:$0xff] }
 0x606   :  { %v776_v42 = vrot.slane %v772_v41, %v1787_v26  ;;  %v957_v40 = vld [vmem:[#allocation7 + $0x148] sm:$0xff]  ;;  %v940_v41 = vld [vmem:[#allocation7 + $0xc0] sm:$0xff]  ;;  %1530 = vmatpush3.msra.mxu0 %v925_v39  ;;  %v966_v39 = vld [vmem:[#allocation7 + $0x190] sm:$0xff] }
 0x607   :  { %1565 = vmatpush3.msra.mxu1 %v957_v40  ;;  %1531 = vmatprep.subr.mxu0 %v940_v41  ;;  %v918_v40 = vld [vmem:[#allocation7 + $0x10] sm:$0xff] }
 0x608   :  { %v1870_v44 = vsub.f32 %v1834_v9, %v776_v42  ;;  %v1873_v57 = vsub.f32 %v1839_v45, %v776_v42  ;;  %v1876_v58 = vsub.f32 %v1836_v43, %v776_v42  ;;  %v1879_v46 = vsub.f32 %v1844_v47, %v776_v42  ;;  %v972_v42 = vld [vmem:[#allocation7 + $0x1c0] sm:$0xff]  ;;  %1532 = vmatpush3.msra.mxu0 %v924_v7 }
 0x609   :  { %1566 = vmatprep.subr.mxu1 %v972_v42  ;;  %v950_v42 = vld [vmem:[#allocation7 + $0x110] sm:$0xff] }
 0x60a   :  { %v781_v48 = vmul.f32 %v1870_v44, %v1870_v44  ;;  %v782_v49 = vmul.f32 %v1873_v57, %v1873_v57  ;;  %v783_v50 = vmul.f32 %v1876_v58, %v1876_v58  ;;  %v784_v45 = vmul.f32 %v1879_v46, %v1879_v46  ;;  %1567 = vmatpush3.msra.mxu1 %v956_v16 }
 0x60b   :  { %1568 = vmatprep.subr.mxu1 %v971_v17 }
 0x60c   :  { %v785_v9 = vrot.slane %v781_v48, 4  ;;  %v791_v51 = vrot.slane %v782_v49, 4  ;;  %v797_v53 = vrot.slane %v783_v50, 4  ;;  %v803_v60 = vrot.slane %v784_v45, 4  ;;  %1569 = vmatpush3.msra.mxu1 %v955_v19 }
 0x60e   :  { %v786_v52 = vadd.f32 %v785_v9, %v781_v48  ;;  %v792_v43 = vadd.f32 %v791_v51, %v782_v49  ;;  %v798_v59 = vadd.f32 %v797_v53, %v783_v50  ;;  %v804_v1 = vadd.f32 %v803_v60, %v784_v45 }
 0x610   :  { %v787_v54 = vrot.slane %v786_v52, 2  ;;  %v793_v47 = vrot.slane %v792_v43, 2  ;;  %v799_v0 = vrot.slane %v798_v59, 2  ;;  %v805_v4 = vrot.slane %v804_v1, 2 }
 0x612   :  { %v788_v55 = vadd.f32 %v787_v54, %v786_v52  ;;  %v794_v56 = vadd.f32 %v793_v47, %v792_v43  ;;  %v800_v3 = vadd.f32 %v799_v0, %v798_v59  ;;  %v806_v6 = vadd.f32 %v805_v4, %v804_v1 }
 0x614   :  { %v789_v61 = vrot.slane %v788_v55, 1  ;;  %v795_v63 = vrot.slane %v794_v56, 1  ;;  %v801_v5 = vrot.slane %v800_v3, 1  ;;  %v807_v11 = vrot.slane %v806_v6, 1 }
 0x616   :  { %v1889_v62 = vadd.f32 %v789_v61, %v788_v55  ;;  %v1895_v2 = vadd.f32 %v795_v63, %v794_v56  ;;  %v1905_v10 = vadd.f32 %v801_v5, %v800_v3  ;;  %v1911_v12 = vadd.f32 %v807_v11, %v806_v6 }
 0x618   :  { %814 = vrot.lane.b32.xlu1 %v1889_v62, %s1715_s27  ;;  %810 = vrot.lane.b32.xlu0 %v1889_v62, %s1716_s9 }
 0x61c   :  { %824 = vrot.lane.b32.xlu1 %v1895_v2, %s1716_s9  ;;  %818 = vrot.lane.b32.xlu0 %v1889_v62, %s1712_s14 }
 0x620   :  { %832 = vrot.lane.b32.xlu1 %v1895_v2, %s1712_s14  ;;  %828 = vrot.lane.b32.xlu0 %v1895_v2, %s1715_s27 }
 0x624   :  { %842 = vrot.lane.b32.xlu1 %v1905_v10, %s1715_s27  ;;  %838 = vrot.lane.b32.xlu0 %v1905_v10, %s1716_s9 }
 0x628   :  { %852 = vrot.lane.b32.xlu1 %v1911_v12, %s1716_s9  ;;  %846 = vrot.lane.b32.xlu0 %v1905_v10, %s1712_s14 }
 0x62c   :  { %860 = vrot.lane.b32.xlu1 %v1911_v12, %s1712_s14  ;;  %856 = vrot.lane.b32.xlu0 %v1911_v12, %s1715_s27 }
 0x630   :  { %884 = vrot.lane.b32.xlu1 %v1924_v13, %s1712_s14 }
 0x68a   :  { %v815_v48 = vpop.permute.xlu1 %814  ;;  %v811_v49 = vpop.permute.xlu0 %810 }
 0x68b   :  { %v813_v50 = vadd.f32 %v811_v49, %v1889_v62  ;;  %v965_v49 = vld [vmem:[#allocation7 + $0x188] sm:$0xff] }
 0x68d   :  { %v817_v9 = vadd.f32 %v815_v48, %v813_v50  ;;  %v933_v48 = vld [vmem:[#allocation7 + $0x88] sm:$0xff] }
 0x68e   :  { %v825_v51 = vpop.permute.xlu1 %824  ;;  %v819_v45 = vpop.permute.xlu0 %818  ;;  %v917_v50 = vld [vmem:[#allocation7 + $0x8] sm:$0xff] }
 0x68f   :  { %v821_v52 = vadd.f32 %v819_v45, %v817_v9  ;;  %v949_v9 = vld [vmem:[#allocation7 + $0x108] sm:$0xff]  ;;  %v964_v45 = vld [vmem:[#allocation7 + $0x180] sm:$0xff] }
 0x691   :  { %v822_v43 = vadd.f32 %v821_v52, %v1895_v2  ;;  %v916_v52 = vld [vmem:[#allocation7] sm:$0xff] }
 0x692   :  { %v829_v53 = vpop.permute.xlu0 %828  ;;  %v833_v47 = vpop.permute.xlu1 %832 }
 0x693   :  { %v827_v54 = vadd.f32 %v825_v51, %v822_v43  ;;  %v932_v51 = vld [vmem:[#allocation7 + $0x80] sm:$0xff] }
 0x694   :  { %v948_v43 = vld [vmem:[#allocation7 + $0x100] sm:$0xff] }
 0x695   :  { %v831_v55 = vadd.f32 %v829_v53, %v827_v54 }
 0x696   :  { %v839_v59 = vpop.permute.xlu0 %838  ;;  %v843_v61 = vpop.permute.xlu1 %842 }
 0x697   :  { %v835_v56 = vadd.f32 %v833_v47, %v831_v55 }
 0x699   :  { %v836_v60 = vadd.f32 %v835_v56, %v1905_v10  ;;  %v939_v10 = vld [vmem:[#allocation7 + $0xb8] sm:$0xff] }
 0x69a   :  { %v847_v1 = vpop.permute.xlu0 %846  ;;  %v853_v62 = vpop.permute.xlu1 %852  ;;  %1533 = vmatprep.subr.mxu0 %v939_v10 }
 0x69b   :  { %v841_v63 = vadd.f32 %v839_v59, %v836_v60  ;;  %1534 = vmatpush3.msra.mxu0 %v923_v18 }
 0x69c   :  { %1535 = vmatprep.subr.mxu0 %v938_v20 }
 0x69d   :  { %v845_v0 = vadd.f32 %v843_v61, %v841_v63  ;;  %1536 = vmatpush3.msra.mxu0 %v922_v21 }
 0x69e   :  { %v857_v6 = vpop.permute.xlu0 %856  ;;  %v861_v2 = vpop.permute.xlu1 %860  ;;  %1537 = vmatprep.subr.mxu0 %v937_v23 }
 0x69f   :  { %v849_v3 = vadd.f32 %v847_v1, %v845_v0  ;;  %1538 = vmatpush3.msra.mxu0 %v921_v25 }
 0x6a0   :  { %1539 = vmatprep.subr.mxu0 %v936_v28 }
 0x6a1   :  { %v850_v4 = vadd.f32 %v849_v3, %v1911_v12  ;;  %v970_v12 = vld [vmem:[#allocation7 + $0x1b0] sm:$0xff]  ;;  %1540 = vmatpush3.msra.mxu0 %v920_v30 }
 0x6a2   :  { %1570 = vmatprep.subr.mxu1 %v970_v12  ;;  %1541 = vmatprep.subr.mxu0 %v935_v33  ;;  %v885_v53 = vpop.permute.xlu1 %884 }
 0x6a3   :  { %v855_v5 = vadd.f32 %v853_v62, %v850_v4  ;;  %1571 = vmatpush3.msra.mxu1 %v954_v22  ;;  %1542 = vmatpush3.msra.mxu0 %v919_v35  ;;  %v893_v0 = vsel %vm768_vm1, %v1924_v13, %v885_v53 }
 0x6a4   :  { %1572 = vmatprep.subr.mxu1 %v969_v24  ;;  %1543 = vmatprep.subr.mxu0 %v934_v38 }
 0x6a5   :  { %v859_v11 = vadd.f32 %v857_v6, %v855_v5  ;;  %1573 = vmatpush3.msra.mxu1 %v953_v27  ;;  %1544 = vmatpush3.msra.mxu0 %v918_v40 }
 0x6a6   :  { %1574 = vmatprep.subr.mxu1 %v968_v29  ;;  %1545 = vmatprep.subr.mxu0 %v933_v48 }
 0x6a7   :  { %v863_v14 = vadd.f32 %v861_v2, %v859_v11  ;;  %1575 = vmatpush3.msra.mxu1 %v952_v31  ;;  %1546 = vmatpush3.msra.mxu0 %v917_v50 }
 0x6a8   :  { %1576 = vmatprep.subr.mxu1 %v967_v34  ;;  %1547 = vmatprep.subr.mxu0 %v932_v51 }
 0x6a9   :  { %v864_v8 = vmul.f32 0.0078125, %v863_v14  ;;  %1577 = vmatpush3.msra.mxu1 %v951_v36  ;;  %1548 = vmatpush3.msra.mxu0 %v916_v52 }
 0x6aa   :  { %1578 = vmatprep.subr.mxu1 %v966_v39 }
 0x6ab   :  { %v865_v15 = vadd.f32 1e-05, %v864_v8  ;;  %1579 = vmatpush3.msra.mxu1 %v950_v42 }
 0x6ac   :  { %1580 = vmatprep.subr.mxu1 %v965_v49 }
 0x6ad   :  { %1614 = vrsqrt.f32 %v865_v15  ;;  %1581 = vmatpush3.msra.mxu1 %v949_v9 }
 0x6ae   :  { %1582 = vmatprep.subr.mxu1 %v964_v45 }
 0x6af   :  { %1583 = vmatpush3.msra.mxu1 %v948_v43 }
 0x6ba   :  { %v1615_v37 = vpop.eup %1614 }
 0x6bb   :  { %v869_v41 = vmul.f32 %v1615_v37, %v867_v32 }
 0x6bd   :  { %874 = vrot.lane.b32.xlu1 %v869_v41, %s1715_s27  ;;  %871 = vrot.lane.b32.xlu0 %v869_v41, %s1712_s14 }
 0x6c1   :  { %877 = vrot.lane.b32.xlu0 %v869_v41, %s1716_s9  ;;  %890 = vrot.lane.b32.xlu1 %v1924_v13, %s1716_s9 }
 0x6c5   :  { %887 = vrot.lane.b32.xlu0 %v1924_v13, %s1715_s27 }
 0x72f   :  { %v872_v54 = vpop.permute.xlu0 %871  ;;  %v875_v47 = vpop.permute.xlu1 %874 }
 0x730   :  { %v880_v55 = vsel %vm768_vm1, %v869_v41, %v872_v54 }
 0x731   :  { %v881_v56 = vsel %vm345_vm0, %v880_v55, %v875_v47 }
 0x733   :  { %v878_v59 = vpop.permute.xlu0 %877  ;;  %v891_v63 = vpop.permute.xlu1 %890 }
 0x734   :  { %v882_v60 = vsel %vm771_vm2, %v881_v56, %v878_v59 }
 0x735   :  { %v899_v61 = vrot.slane %v882_v60, %v1787_v26 }
 0x737   :  { %v888_v1 = vpop.permute.xlu0 %887  ;;  %v901_v4 = vmul.f32 %v899_v61, %v1873_v57  ;;  %v903_v6 = vmul.f32 %v899_v61, %v1879_v46  ;;  %v900_v11 = vmul.f32 %v899_v61, %v1870_v44  ;;  %v902_v2 = vmul.f32 %v899_v61, %v1876_v58 }
 0x738   :  { %v894_v3 = vsel %vm345_vm0, %v893_v0, %v888_v1 }
 0x739   :  { %v895_v62 = vsel %vm771_vm2, %v894_v3, %v891_v63 }
 0x73a   :  { %v907_v5 = vrot.slane %v895_v62, %v1787_v26 }
 0x73c   :  { %v909_v14 = vadd.f32 %v907_v5, %v901_v4  ;;  %v911_v8 = vadd.f32 %v907_v5, %v903_v6  ;;  %v908_v15 = vadd.f32 %v907_v5, %v900_v11  ;;  %v910_v7 = vadd.f32 %v907_v5, %v902_v2 }
 0x73e   :  { %v913_v13 = vmax.f32 %v909_v14, 0.0  ;;  %v915_v16 = vmax.f32 %v911_v8, 0.0  ;;  %v912_v10 = vmax.f32 %v908_v15, 0.0  ;;  %v914_v17 = vmax.f32 %v910_v7, 0.0 }
 0x740   :  { %1044 = vmatprep.mubr.f32.mxu0 %v913_v13  ;;  %1114 = vmatprep.mubr.f32.mxu1 %v915_v16 }
 0x741   :  { %1045 = vmatmul.mubr.f32.vlgmr.msra.gmra.mxu0 %v912_v10  ;;  %1115 = vmatmul.mubr.f32.vlgmr.msra.gmra.mxu1 %v914_v17 }
 0x801   :  { %v1549_v57 = vpop.f32.mrf.mxu0  ;;  %v1584_v18 = vpop.f32.mrf.mxu1 }
 0x803   :  { %v1550_v19 = vpop.f32.mrf.mxu0  ;;  %v1585_v46 = vpop.f32.mrf.mxu1 }
 0x804   :  { %v1551_v20 = vadd.f32 %v1550_v19, %v1549_v57  ;;  %v1586_v44 = vadd.f32 %v1585_v46, %v1584_v18 }
 0x806   :  { %v1955_v12 = vadd.f32 %v1586_v44, %v1551_v20 }
 0x808   :  { %v1120_v58 = vrot.slane %v1955_v12, 4 }
 0x80a   :  { %v1121_v21 = vadd.f32 %v1120_v58, %v1955_v12 }
 0x80c   :  { %v1122_v22 = vrot.slane %v1121_v21, 2 }
 0x80e   :  { %v1123_v23 = vadd.f32 %v1122_v22, %v1121_v21 }
 0x810   :  { %v1124_v24 = vrot.slane %v1123_v23, 1 }
 0x812   :  { %v1125_v25 = vadd.f32 %v1124_v24, %v1123_v23 }
 0x814   :  { %1131 = vrot.lane.b32.xlu1 %v1125_v25, %s1717_s13  ;;  %1127 = vrot.lane.b32.xlu0 %v1125_v25, %s1718_s15 }
 0x818   :  { %1139 = vrot.lane.b32.xlu1 %v1125_v25, %s1716_s9  ;;  %1135 = vrot.lane.b32.xlu0 %v1125_v25, %s1719_s16 }
 0x81c   :  { %1147 = vrot.lane.b32.xlu1 %v1125_v25, %s1720_s17  ;;  %1143 = vrot.lane.b32.xlu0 %v1125_v25, %s1721_s18 }
 0x820   :  { %1155 = vrot.lane.b32.xlu1 %v1125_v25, %s1715_s27  ;;  %1151 = vrot.lane.b32.xlu0 %v1125_v25, %s1722_s1 }
 0x824   :  { %1163 = vrot.lane.b32.xlu1 %v1125_v25, %s1723_s19  ;;  %1159 = vrot.lane.b32.xlu0 %v1125_v25, %s1724_s20 }
 0x828   :  { %1171 = vrot.lane.b32.xlu1 %v1125_v25, %s1712_s14  ;;  %1167 = vrot.lane.b32.xlu0 %v1125_v25, %s1725_s3 }
 0x82c   :  { %1179 = vrot.lane.b32.xlu1 %v1125_v25, %s1706_s25  ;;  %1175 = vrot.lane.b32.xlu0 %v1125_v25, %s1726_s4 }
 0x830   :  { %1183 = vrot.lane.b32.xlu0 %v1125_v25, %s1709_s8 }
 0x886   :  { %v1132_v27 = vpop.permute.xlu1 %1131  ;;  %v1128_v28 = vpop.permute.xlu0 %1127 }
 0x887   :  { %v1130_v29 = vadd.f32 %v1128_v28, %v1125_v25 }
 0x889   :  { %v1134_v30 = vadd.f32 %v1132_v27, %v1130_v29 }
 0x88a   :  { %v1140_v31 = vpop.permute.xlu1 %1139  ;;  %v1136_v32 = vpop.permute.xlu0 %1135 }
 0x88b   :  { %v1138_v33 = vadd.f32 %v1136_v32, %v1134_v30 }
 0x88d   :  { %v1142_v34 = vadd.f32 %v1140_v31, %v1138_v33 }
 0x88e   :  { %v1148_v35 = vpop.permute.xlu1 %1147  ;;  %v1144_v36 = vpop.permute.xlu0 %1143 }
 0x88f   :  { %v1146_v37 = vadd.f32 %v1144_v36, %v1142_v34 }
 0x891   :  { %v1150_v38 = vadd.f32 %v1148_v35, %v1146_v37 }
 0x892   :  { %v1156_v39 = vpop.permute.xlu1 %1155  ;;  %v1152_v40 = vpop.permute.xlu0 %1151 }
 0x893   :  { %v1154_v41 = vadd.f32 %v1152_v40, %v1150_v38 }
 0x895   :  { %v1158_v42 = vadd.f32 %v1156_v39, %v1154_v41 }
 0x896   :  { %v1164_v48 = vpop.permute.xlu1 %1163  ;;  %v1160_v49 = vpop.permute.xlu0 %1159 }
 0x897   :  { %v1162_v50 = vadd.f32 %v1160_v49, %v1158_v42 }
 0x899   :  { %v1166_v9 = vadd.f32 %v1164_v48, %v1162_v50 }
 0x89a   :  { %v1172_v51 = vpop.permute.xlu1 %1171  ;;  %v1168_v45 = vpop.permute.xlu0 %1167 }
 0x89b   :  { %v1170_v52 = vadd.f32 %v1168_v45, %v1166_v9 }
 0x89d   :  { %v1174_v43 = vadd.f32 %v1172_v51, %v1170_v52 }
 0x89e   :  { %v1176_v53 = vpop.permute.xlu0 %1175  ;;  %v1180_v47 = vpop.permute.xlu1 %1179 }
 0x89f   :  { %v1178_v54 = vadd.f32 %v1176_v53, %v1174_v43 }
 0x8a1   :  { %v1182_v55 = vadd.f32 %v1180_v47, %v1178_v54 }
 0x8a2   :  { %v1184_v56 = vpop.permute.xlu0 %1183 }
 0x8a3   :  { %v1186_v59 = vadd.f32 %v1184_v56, %v1182_v55 }
 0x8a5   :  { %v1187_v60 = vmul.f32 0.0078125, %v1186_v59 }
 0x8a7   :  { %1192 = vrot.lane.b32.xlu0 %v1187_v60, %s1706_s25  ;;  %1189 = vrot.lane.b32.xlu1 %v1187_v60, %s1709_s8 }
 0x8ab   :  { %1198 = vrot.lane.b32.xlu0 %v1187_v60, %s1712_s14  ;;  %1195 = vrot.lane.b32.xlu1 %v1187_v60, %s1726_s4 }
 0x8af   :  { %1204 = vrot.lane.b32.xlu0 %v1187_v60, %s1723_s19  ;;  %1201 = vrot.lane.b32.xlu1 %v1187_v60, %s1725_s3 }
 0x8b3   :  { %1210 = vrot.lane.b32.xlu0 %v1187_v60, %s1715_s27  ;;  %1207 = vrot.lane.b32.xlu1 %v1187_v60, %s1724_s20 }
 0x8b7   :  { %1216 = vrot.lane.b32.xlu0 %v1187_v60, %s1720_s17  ;;  %1213 = vrot.lane.b32.xlu1 %v1187_v60, %s1722_s1 }
 0x8bb   :  { %1222 = vrot.lane.b32.xlu0 %v1187_v60, %s1716_s9  ;;  %1219 = vrot.lane.b32.xlu1 %v1187_v60, %s1721_s18 }
 0x8bf   :  { %1228 = vrot.lane.b32.xlu0 %v1187_v60, %s1717_s13  ;;  %1225 = vrot.lane.b32.xlu1 %v1187_v60, %s1719_s16 }
 0x8c3   :  { %1231 = vrot.lane.b32.xlu1 %v1187_v60, %s1718_s15 }
 0x919   :  { %v1193_v61 = vpop.permute.xlu0 %1192  ;;  %v1190_v63 = vpop.permute.xlu1 %1189 }
 0x91a   :  { %v1235_v0 = vsel %vm1234_vm3, %v1187_v60, %v1190_v63 }
 0x91b   :  { %v1237_v3 = vsel %vm1236_vm4, %v1235_v0, %v1193_v61 }
 0x91d   :  { %v1199_v1 = vpop.permute.xlu0 %1198  ;;  %v1196_v62 = vpop.permute.xlu1 %1195 }
 0x91e   :  { %v1239_v4 = vsel %vm1238_vm5, %v1237_v3, %v1196_v62 }
 0x91f   :  { %v1240_v6 = vsel %vm768_vm1, %v1239_v4, %v1199_v1 }
 0x921   :  { %v1205_v5 = vpop.permute.xlu0 %1204  ;;  %v1202_v11 = vpop.permute.xlu1 %1201 }
 0x922   :  { %v1242_v2 = vsel %vm1241_vm6, %v1240_v6, %v1202_v11  ;;  %v1337_v11 = vld [vmem:[%s2120_s5 + $0x6] sm:$0x1] }
 0x923   :  { %v1244_v8 = vsel %vm1243_vm7, %v1242_v2, %v1205_v5 }
 0x925   :  { %v1211_v14 = vpop.permute.xlu0 %1210  ;;  %v1208_v15 = vpop.permute.xlu1 %1207 }
 0x926   :  { %v1246_v7 = vsel %vm1245_vm8, %v1244_v8, %v1208_v15 }
 0x927   :  { %v1247_v16 = vsel %vm345_vm0, %v1246_v7, %v1211_v14 }
 0x929   :  { %v1217_v13 = vpop.permute.xlu0 %1216  ;;  %v1214_v10 = vpop.permute.xlu1 %1213 }
 0x92a   :  { %v1249_v17 = vsel %vm1248_vm9, %v1247_v16, %v1214_v10 }
 0x92b   :  { %v1251_v18 = vsel %vm1250_vm10, %v1249_v17, %v1217_v13 }
 0x92d   :  { %v1223_v57 = vpop.permute.xlu0 %1222  ;;  %v1220_v19 = vpop.permute.xlu1 %1219 }
 0x92e   :  { %v1253_v46 = vsel %vm1252_vm11, %v1251_v18, %v1220_v19 }
 0x92f   :  { %v1254_v20 = vsel %vm771_vm2, %v1253_v46, %v1223_v57 }
 0x931   :  { %v1226_v44 = vpop.permute.xlu1 %1225  ;;  %v1229_v58 = vpop.permute.xlu0 %1228 }
 0x932   :  { %v1256_v21 = vsel %vm1255_vm12, %v1254_v20, %v1226_v44 }
 0x933   :  { %v1258_v22 = vsel %vm1257_vm13, %v1256_v21, %v1229_v58 }
 0x935   :  { %v1232_v23 = vpop.permute.xlu1 %1231 }
 0x936   :  { %v1260_v24 = vsel %vm1259_vm14, %v1258_v22, %v1232_v23 }
 0x937   :  { %v1264_v25 = vrot.slane %v1260_v24, %v1787_v26 }
 0x939   :  { %v2006_v27 = vsub.f32 %v1955_v12, %v1264_v25  ;;  %v2028_v12 = vld [vmem:[%s2120_s5 + $0x7] sm:$0x1] }
 0x93b   :  { %v1266_v28 = vmul.f32 %v2006_v27, %v2006_v27 }
 0x93d   :  { %v1267_v29 = vrot.slane %v1266_v28, 4 }
 0x93f   :  { %v1268_v30 = vadd.f32 %v1267_v29, %v1266_v28 }
 0x941   :  { %v1269_v31 = vrot.slane %v1268_v30, 2 }
 0x943   :  { %v1270_v32 = vadd.f32 %v1269_v31, %v1268_v30 }
 0x945   :  { %v1271_v33 = vrot.slane %v1270_v32, 1 }
 0x947   :  { %v1272_v34 = vadd.f32 %v1271_v33, %v1270_v32 }
 0x949   :  { %1278 = vrot.lane.b32.xlu1 %v1272_v34, %s1717_s13  ;;  %1274 = vrot.lane.b32.xlu0 %v1272_v34, %s1718_s15 }
 0x94d   :  { %1286 = vrot.lane.b32.xlu1 %v1272_v34, %s1716_s9  ;;  %1282 = vrot.lane.b32.xlu0 %v1272_v34, %s1719_s16 }
 0x951   :  { %1294 = vrot.lane.b32.xlu1 %v1272_v34, %s1720_s17  ;;  %1290 = vrot.lane.b32.xlu0 %v1272_v34, %s1721_s18 }
 0x955   :  { %1302 = vrot.lane.b32.xlu1 %v1272_v34, %s1715_s27  ;;  %1298 = vrot.lane.b32.xlu0 %v1272_v34, %s1722_s1 }
 0x959   :  { %1310 = vrot.lane.b32.xlu1 %v1272_v34, %s1723_s19  ;;  %1306 = vrot.lane.b32.xlu0 %v1272_v34, %s1724_s20 }
 0x95d   :  { %1318 = vrot.lane.b32.xlu1 %v1272_v34, %s1712_s14  ;;  %1314 = vrot.lane.b32.xlu0 %v1272_v34, %s1725_s3 }
 0x961   :  { %1326 = vrot.lane.b32.xlu1 %v1272_v34, %s1706_s25  ;;  %1322 = vrot.lane.b32.xlu0 %v1272_v34, %s1726_s4 }
 0x965   :  { %1330 = vrot.lane.b32.xlu0 %v1272_v34, %s1709_s8 }
 0x969   :  { %1402 = vrot.lane.b32.xlu0 %v2028_v12, %s1709_s8 }
 0x96d   :  { %1405 = vrot.lane.b32.xlu0 %v2028_v12, %s1706_s25 }
 0x971   :  { %1408 = vrot.lane.b32.xlu0 %v2028_v12, %s1726_s4 }
 0x975   :  { %1411 = vrot.lane.b32.xlu0 %v2028_v12, %s1712_s14 }
 0x979   :  { %1414 = vrot.lane.b32.xlu0 %v2028_v12, %s1725_s3 }
 0x97d   :  { %1417 = vrot.lane.b32.xlu0 %v2028_v12, %s1723_s19 }
 0x981   :  { %1420 = vrot.lane.b32.xlu0 %v2028_v12, %s1724_s20 }
 0x985   :  { %1423 = vrot.lane.b32.xlu0 %v2028_v12, %s1715_s27 }
 0x989   :  { %1426 = vrot.lane.b32.xlu0 %v2028_v12, %s1722_s1 }
 0x98d   :  { %1429 = vrot.lane.b32.xlu0 %v2028_v12, %s1720_s17 }
 0x9bb   :  { %v1279_v35 = vpop.permute.xlu1 %1278  ;;  %v1275_v36 = vpop.permute.xlu0 %1274 }
 0x9bc   :  { %v1277_v37 = vadd.f32 %v1275_v36, %v1272_v34 }
 0x9be   :  { %v1281_v38 = vadd.f32 %v1279_v35, %v1277_v37 }
 0x9bf   :  { %v1287_v39 = vpop.permute.xlu1 %1286  ;;  %v1283_v40 = vpop.permute.xlu0 %1282 }
 0x9c0   :  { %v1285_v41 = vadd.f32 %v1283_v40, %v1281_v38 }
 0x9c2   :  { %v1289_v42 = vadd.f32 %v1287_v39, %v1285_v41 }
 0x9c3   :  { %v1295_v48 = vpop.permute.xlu1 %1294  ;;  %v1291_v49 = vpop.permute.xlu0 %1290 }
 0x9c4   :  { %v1293_v50 = vadd.f32 %v1291_v49, %v1289_v42 }
 0x9c6   :  { %v1297_v9 = vadd.f32 %v1295_v48, %v1293_v50 }
 0x9c7   :  { %v1303_v51 = vpop.permute.xlu1 %1302  ;;  %v1299_v45 = vpop.permute.xlu0 %1298 }
 0x9c8   :  { %v1301_v52 = vadd.f32 %v1299_v45, %v1297_v9 }
 0x9ca   :  { %v1305_v43 = vadd.f32 %v1303_v51, %v1301_v52 }
 0x9cb   :  { %v1311_v53 = vpop.permute.xlu1 %1310  ;;  %v1307_v54 = vpop.permute.xlu0 %1306 }
 0x9cc   :  { %v1309_v47 = vadd.f32 %v1307_v54, %v1305_v43 }
 0x9ce   :  { %v1313_v55 = vadd.f32 %v1311_v53, %v1309_v47 }
 0x9cf   :  { %v1319_v56 = vpop.permute.xlu1 %1318  ;;  %v1315_v59 = vpop.permute.xlu0 %1314 }
 0x9d0   :  { %v1317_v60 = vadd.f32 %v1315_v59, %v1313_v55 }
 0x9d2   :  { %v1321_v61 = vadd.f32 %v1319_v56, %v1317_v60 }
 0x9d3   :  { %v1323_v63 = vpop.permute.xlu0 %1322  ;;  %v1327_v1 = vpop.permute.xlu1 %1326 }
 0x9d4   :  { %v1325_v0 = vadd.f32 %v1323_v63, %v1321_v61 }
 0x9d6   :  { %v1329_v3 = vadd.f32 %v1327_v1, %v1325_v0 }
 0x9d7   :  { %v1331_v62 = vpop.permute.xlu0 %1330 }
 0x9d8   :  { %v1333_v4 = vadd.f32 %v1331_v62, %v1329_v3 }
 0x9da   :  { %v1334_v5 = vmul.f32 0.0078125, %v1333_v4 }
 0x9db   :  { %v1403_v8 = vpop.permute.xlu0 %1402 }
 0x9dc   :  { %v1335_v6 = vadd.f32 1e-05, %v1334_v5  ;;  %v1447_v58 = vsel %vm1234_vm3, %v2028_v12, %v1403_v8 }
 0x9de   :  { %1616 = vrsqrt.f32 %v1335_v6 }
 0x9df   :  { %v1406_v15 = vpop.permute.xlu0 %1405 }
 0x9e0   :  { %v1448_v23 = vsel %vm1236_vm4, %v1447_v58, %v1406_v15 }
 0x9e3   :  { %v1409_v7 = vpop.permute.xlu0 %1408 }
 0x9e4   :  { %v1449_v25 = vsel %vm1238_vm5, %v1448_v23, %v1409_v7 }
 0x9e7   :  { %v1412_v13 = vpop.permute.xlu0 %1411 }
 0x9e8   :  { %v1450_v30 = vsel %vm768_vm1, %v1449_v25, %v1412_v13 }
 0x9eb   :  { %v1617_v2 = vpop.eup %1616  ;;  %v1415_v16 = vpop.permute.xlu0 %1414 }
 0x9ec   :  { %v1339_v14 = vmul.f32 %v1617_v2, %v1337_v11  ;;  %v1451_v31 = vsel %vm1241_vm6, %v1450_v30, %v1415_v16 }
 0x9ee   :  { %1344 = vrot.lane.b32.xlu0 %v1339_v14, %s1706_s25  ;;  %1341 = vrot.lane.b32.xlu1 %v1339_v14, %s1709_s8 }
 0x9ef   :  { %v1418_v17 = vpop.permute.xlu0 %1417 }
 0x9f0   :  { %v1452_v34 = vsel %vm1243_vm7, %v1451_v31, %v1418_v17 }
 0x9f2   :  { %1347 = vrot.lane.b32.xlu1 %v1339_v14, %s1726_s4  ;;  %1432 = vrot.lane.b32.xlu0 %v2028_v12, %s1721_s18 }
 0x9f3   :  { %v1421_v19 = vpop.permute.xlu0 %1420 }
 0x9f4   :  { %v1453_v36 = vsel %vm1245_vm8, %v1452_v34, %v1421_v19 }
 0x9f6   :  { %1350 = vrot.lane.b32.xlu1 %v1339_v14, %s1712_s14  ;;  %1435 = vrot.lane.b32.xlu0 %v2028_v12, %s1716_s9 }
 0x9f7   :  { %v1424_v20 = vpop.permute.xlu0 %1423 }
 0x9f8   :  { %v1454_v40 = vsel %vm345_vm0, %v1453_v36, %v1424_v20 }
 0x9fa   :  { %1353 = vrot.lane.b32.xlu1 %v1339_v14, %s1725_s3  ;;  %1438 = vrot.lane.b32.xlu0 %v2028_v12, %s1719_s16 }
 0x9fb   :  { %v1427_v22 = vpop.permute.xlu0 %1426 }
 0x9fc   :  { %v1455_v49 = vsel %vm1248_vm9, %v1454_v40, %v1427_v22 }
 0x9fe   :  { %1356 = vrot.lane.b32.xlu1 %v1339_v14, %s1723_s19  ;;  %1444 = vrot.lane.b32.xlu0 %v2028_v12, %s1718_s15 }
 0x9ff   :  { %v1430_v28 = vpop.permute.xlu0 %1429 }
 0xa00   :  { %v1456_v43 = vsel %vm1250_vm10, %v1455_v49, %v1430_v28 }
 0xa02   :  { %1359 = vrot.lane.b32.xlu1 %v1339_v14, %s1724_s20 }
 0xa06   :  { %1362 = vrot.lane.b32.xlu1 %v1339_v14, %s1715_s27 }
 0xa0a   :  { %1365 = vrot.lane.b32.xlu1 %v1339_v14, %s1722_s1 }
 0xa0e   :  { %1368 = vrot.lane.b32.xlu1 %v1339_v14, %s1720_s17 }
 0xa12   :  { %1371 = vrot.lane.b32.xlu1 %v1339_v14, %s1721_s18 }
 0xa16   :  { %1374 = vrot.lane.b32.xlu1 %v1339_v14, %s1716_s9 }
 0xa1a   :  { %1377 = vrot.lane.b32.xlu1 %v1339_v14, %s1719_s16 }
 0xa1e   :  { %1380 = vrot.lane.b32.xlu1 %v1339_v14, %s1717_s13 }
 0xa22   :  { %1383 = vrot.lane.b32.xlu1 %v1339_v14, %s1718_s15 }
 0xa26   :  { %1441 = vrot.lane.b32.xlu1 %v2028_v12, %s1717_s13 }
 0xa60   :  { %v1342_v10 = vpop.permute.xlu1 %1341  ;;  %v1345_v33 = vpop.permute.xlu0 %1344 }
 0xa61   :  { %v1386_v12 = vsel %vm1234_vm3, %v1339_v14, %v1342_v10 }
 0xa62   :  { %v1387_v38 = vsel %vm1236_vm4, %v1386_v12, %v1345_v33 }
 0xa64   :  { %v1348_v57 = vpop.permute.xlu1 %1347  ;;  %v1433_v37 = vpop.permute.xlu0 %1432 }
 0xa65   :  { %v1388_v41 = vsel %vm1238_vm5, %v1387_v38, %v1348_v57  ;;  %v1457_v56 = vsel %vm1252_vm11, %v1456_v43, %v1433_v37 }
 0xa68   :  { %v1351_v18 = vpop.permute.xlu1 %1350  ;;  %v1436_v51 = vpop.permute.xlu0 %1435 }
 0xa69   :  { %v1389_v42 = vsel %vm768_vm1, %v1388_v41, %v1351_v18  ;;  %v1458_v1 = vsel %vm771_vm2, %v1457_v56, %v1436_v51 }
 0xa6c   :  { %v1354_v46 = vpop.permute.xlu1 %1353  ;;  %v1439_v60 = vpop.permute.xlu0 %1438 }
 0xa6d   :  { %v1390_v48 = vsel %vm1241_vm6, %v1389_v42, %v1354_v46  ;;  %v1459_v5 = vsel %vm1255_vm12, %v1458_v1, %v1439_v60 }
 0xa70   :  { %v1357_v44 = vpop.permute.xlu1 %1356  ;;  %v1445_v4 = vpop.permute.xlu0 %1444 }
 0xa71   :  { %v1391_v50 = vsel %vm1243_vm7, %v1390_v48, %v1357_v44 }
 0xa74   :  { %v1360_v21 = vpop.permute.xlu1 %1359 }
 0xa75   :  { %v1392_v45 = vsel %vm1245_vm8, %v1391_v50, %v1360_v21 }
 0xa78   :  { %v1363_v24 = vpop.permute.xlu1 %1362 }
 0xa79   :  { %v1393_v52 = vsel %vm345_vm0, %v1392_v45, %v1363_v24 }
 0xa7c   :  { %v1366_v29 = vpop.permute.xlu1 %1365 }
 0xa7d   :  { %v1394_v53 = vsel %vm1248_vm9, %v1393_v52, %v1366_v29 }
 0xa80   :  { %v1369_v32 = vpop.permute.xlu1 %1368 }
 0xa81   :  { %v1395_v54 = vsel %vm1250_vm10, %v1394_v53, %v1369_v32 }
 0xa84   :  { %v1372_v35 = vpop.permute.xlu1 %1371 }
 0xa85   :  { %v1396_v55 = vsel %vm1252_vm11, %v1395_v54, %v1372_v35 }
 0xa88   :  { %v1375_v39 = vpop.permute.xlu1 %1374 }
 0xa89   :  { %v1397_v59 = vsel %vm771_vm2, %v1396_v55, %v1375_v39 }
 0xa8c   :  { %v1378_v9 = vpop.permute.xlu1 %1377 }
 0xa8d   :  { %v1398_v61 = vsel %vm1255_vm12, %v1397_v59, %v1378_v9 }
 0xa90   :  { %v1381_v47 = vpop.permute.xlu1 %1380 }
 0xa91   :  { %v1399_v63 = vsel %vm1257_vm13, %v1398_v61, %v1381_v47 }
 0xa94   :  { %v1384_v0 = vpop.permute.xlu1 %1383 }
 0xa95   :  { %v1400_v3 = vsel %vm1259_vm14, %v1399_v63, %v1384_v0 }
 0xa96   :  { %v1465_v62 = vrot.slane %v1400_v3, %v1787_v26 }
 0xa98   :  { %v1442_v6 = vpop.permute.xlu1 %1441  ;;  %v1466_v14 = vmul.f32 %v1465_v62, %v2006_v27 }
 0xa99   :  { %v1460_v11 = vsel %vm1257_vm13, %v1459_v5, %v1442_v6 }
 0xa9a   :  { %v1461_v2 = vsel %vm1259_vm14, %v1460_v11, %v1445_v4 }
 0xa9b   :  { %v1470_v8 = vrot.slane %v1461_v2, %v1787_v26 }
 0xa9d   :  { %v1471_v15 = vadd.f32 %v1470_v8, %v1466_v14 }
 0xa9f   :  { %v1472_v7 = vmax.f32 %v1471_v15, 0.0 }
 0xaa1   :  { %1473 = vst [vmem:[%s2121_s6] sm:$0xff] %v1472_v7 }
 0xaa2   :  { %1478 = vsyncpa [#allocation3], 1 }
 0xaa3   :  { %1479 = vsyncpa [#allocation5], 1 }
 0xaa4   :  { %1480 = vsyncpa [#allocation8], 1 }

</bundles_post_ra>
